<compile_context>
chip_gen: v6e
topology: v6e:2x2x1
jax: 0.10.0
libtpu: 0.0.40
codegen_flags: <defaults>
</compile_context>

<pallas_src>
import numpy as np
import jax
import jax.numpy as jnp
from jax.experimental import pallas as pl
from jax.experimental.pallas import tpu as pltpu

H1, H2 = 400, 300          # logical hidden sizes (PyTorch ActorModel)
H1P, H2P = 512, 384        # lane-padded hidden sizes (multiples of 128)
AOUT_PAD = 128             # lane-padded output width


def _round_up(x, m):
    return (x + m - 1) // m * m


def actor_mlp_kernel(x_ref, w1_ref, b1_ref, w2_ref, b2_ref, w3_ref, b3_ref, o_ref):
    # fc1 + relu  (bf16 MXU matmul, f32 accumulation / f32 epilogue)
    h1 = jnp.dot(x_ref[...].astype(jnp.bfloat16), w1_ref[...],
                 preferred_element_type=jnp.float32)
    h1 = jnp.maximum(h1 + b1_ref[...], 0.0)
    # fc2 + relu
    h2 = jnp.dot(h1.astype(jnp.bfloat16), w2_ref[...],
                 preferred_element_type=jnp.float32)
    h2 = jnp.maximum(h2 + b2_ref[...], 0.0)
    # fc3 + tanh  (tanh on EUP; free next to the MXU)
    h3 = jnp.dot(h2.astype(jnp.bfloat16), w3_ref[...],
                 preferred_element_type=jnp.float32)
    o_ref[...] = jnp.tanh(h3 + b3_ref[...]).astype(o_ref.dtype)


def actor_forward(states, packed, *, tile_b=128):
    """states: (B, input_size) f32.  packed: dict from pack_actor_params()."""
    w1, b1 = packed["w1"], packed["b1"]
    w2, b2 = packed["w2"], packed["b2"]
    w3, b3 = packed["w3"], packed["b3"]
    action_size = packed["action_size"]

    B, d_in = states.shape
    tile_b = min(tile_b, _round_up(max(B, 1), 8))
    Bp = _round_up(B, tile_b)
    if Bp != B:
        states = jnp.pad(states, ((0, Bp - B), (0, 0)))

    const = lambda i: (0, 0)   # weights/biases: same block every step -> stay resident
    out = pl.pallas_call(
        actor_mlp_kernel,
        out_shape=jax.ShapeDtypeStruct((Bp, AOUT_PAD), jnp.float32),
        grid_spec=pltpu.PrefetchScalarGridSpec(
            num_scalar_prefetch=0,
            grid=(Bp // tile_b,),
            in_specs=[
                pl.BlockSpec((tile_b, d_in), lambda i: (i, 0)),   # x batch tile
                pl.BlockSpec((d_in, H1P), const),                 # w1 (in, out) bf16
                pl.BlockSpec((1, H1P), const),                    # b1 f32
                pl.BlockSpec((H1P, H2P), const),                  # w2
                pl.BlockSpec((1, H2P), const),                    # b2
                pl.BlockSpec((H2P, AOUT_PAD), const),             # w3
                pl.BlockSpec((1, AOUT_PAD), const),               # b3
            ],
            out_specs=pl.BlockSpec((tile_b, AOUT_PAD), lambda i: (i, 0)),
        ),
        compiler_params=pltpu.CompilerParams(
            dimension_semantics=("parallel",),   # batch axis shards across v7x's 2 TCs
        ),
    )(states, w1, b1, w2, b2, w3, b3)
    return out[:B, :action_size]


def init_actor_params(key, input_size, action_size):
    """Raw PyTorch-style params (out, in), f32, mirroring ActorModel.reset_parameters.

    lecunishUniformInitializer uses weight.size()[0] (= out_features) as fan_in;
    reproduced exactly.  Biases use PyTorch's default uniform(-1/sqrt(in), 1/sqrt(in)).
    """
    k1, k2, k3, k4, k5, k6 = jax.random.split(key, 6)

    def uniform(k, shape, limit):
        return jax.random.uniform(k, shape, jnp.float32, -limit, limit)

    w1 = uniform(k1, (H1, input_size), float(np.sqrt(1.0 / H1)))
    b1 = uniform(k4, (H1,), float(1.0 / np.sqrt(input_size)))
    w2 = uniform(k2, (H2, H1), float(np.sqrt(1.0 / H2)))
    b2 = uniform(k5, (H2,), float(1.0 / np.sqrt(H1)))
    w3 = uniform(k3, (action_size, H2), 0.003)
    b3 = uniform(k6, (action_size,), float(1.0 / np.sqrt(H2)))
    return {"w1": w1, "b1": b1, "w2": w2, "b2": b2, "w3": w3, "b3": b3}


def pack_actor_params(params, weight_dtype=jnp.bfloat16):
    """One-time packing: transpose to (in, out), zero-pad to lane multiples, cast weights."""
    action_size = params["w3"].shape[0]
    d_in = params["w1"].shape[1]

    def pack_w(w, in_pad, out_pad):
        wt = jnp.asarray(w, jnp.float32).T                       # (in, out)
        wt = jnp.pad(wt, ((0, in_pad - wt.shape[0]), (0, out_pad - wt.shape[1])))
        return wt.astype(weight_dtype)

    def pack_b(b, out_pad):
        b = jnp.asarray(b, jnp.float32).reshape(1, -1)
        return jnp.pad(b, ((0, 0), (0, out_pad - b.shape[1])))   # padded bias entries = 0

    return {
        "w1": pack_w(params["w1"], d_in, H1P),
        "b1": pack_b(params["b1"], H1P),
        "w2": pack_w(params["w2"], H1P, H2P),
        "b2": pack_b(params["b2"], H2P),
        "w3": pack_w(params["w3"], H2P, AOUT_PAD),
        "b3": pack_b(params["b3"], AOUT_PAD),
        "action_size": action_size,
    }


if __name__ == "__main__":
    INPUT_SIZE = 32
    ACTION_SIZE = 4
    BATCH = 256   # batched call: amortizes weight DMA over a grid of 128-row tiles

    key = jax.random.PRNGKey(0)
    pkey, xkey = jax.random.split(key)
    params = init_actor_params(pkey, INPUT_SIZE, ACTION_SIZE)
    packed = pack_actor_params(params)            # pre-transposed / padded / bf16, once
    states = jax.random.normal(xkey, (BATCH, INPUT_SIZE), jnp.float32)

    out = jax.block_until_ready(actor_forward(states, packed))
    assert out.shape == (BATCH, ACTION_SIZE)

    # Pure-JAX f32 reference (original module semantics).
    h1 = jnp.maximum(states @ params["w1"].T + params["b1"], 0.0)
    h2 = jnp.maximum(h1 @ params["w2"].T + params["b2"], 0.0)
    ref = jnp.tanh(h2 @ params["w3"].T + params["b3"])
    # bf16 weights/activations in the matmuls -> relaxed tolerance (per review).
    np.testing.assert_allclose(np.asarray(out), np.asarray(ref), rtol=2e-2, atol=2e-2)

    # Small / non-tile-aligned batch path (wrapper pads to the tile and slices back).
    out_small = jax.block_until_ready(actor_forward(states[:2], packed))
    assert out_small.shape == (2, ACTION_SIZE)
    np.testing.assert_allclose(np.asarray(out_small), np.asarray(ref[:2]),
                               rtol=2e-2, atol=2e-2)

    print("KERNEL_OK")
</pallas_src>

<mosaic_0001>
module attributes {stable_mosaic.version = 11 : i64} {
  func.func @actor_mlp_kernel(%arg0: i32, %arg1: memref<128x32xf32, #tpu.memory_space<vmem>>, %arg2: memref<32x512xbf16, #tpu.memory_space<vmem>>, %arg3: memref<1x512xf32, #tpu.memory_space<vmem>>, %arg4: memref<512x384xbf16, #tpu.memory_space<vmem>>, %arg5: memref<1x384xf32, #tpu.memory_space<vmem>>, %arg6: memref<384x128xbf16, #tpu.memory_space<vmem>>, %arg7: memref<1x128xf32, #tpu.memory_space<vmem>>, %arg8: memref<128x128xf32, #tpu.memory_space<vmem>>) attributes {dimension_semantics = [#tpu.dimension_semantics<parallel>], iteration_bounds = array<i64: 2>, scalar_prefetch = 0 : i64, scratch_operands = 0 : i64, tpu.core_type = #tpu.core_type<tc>, window_params = [{transform_indices = @transform_0, window_bounds = array<i64: 128, 32>}, {pipeline_mode = #tpu.pipeline_mode<synchronous>, transform_indices = @transform_1, window_bounds = array<i64: 32, 512>}, {pipeline_mode = #tpu.pipeline_mode<synchronous>, transform_indices = @transform_2, window_bounds = array<i64: 1, 512>}, {pipeline_mode = #tpu.pipeline_mode<synchronous>, transform_indices = @transform_3, window_bounds = array<i64: 512, 384>}, {pipeline_mode = #tpu.pipeline_mode<synchronous>, transform_indices = @transform_4, window_bounds = array<i64: 1, 384>}, {pipeline_mode = #tpu.pipeline_mode<synchronous>, transform_indices = @transform_5, window_bounds = array<i64: 384, 128>}, {pipeline_mode = #tpu.pipeline_mode<synchronous>, transform_indices = @transform_6, window_bounds = array<i64: 1, 128>}, {transform_indices = @transform_7, window_bounds = array<i64: 128, 128>}]} {
    %c0 = arith.constant 0 : index
    %c0_0 = arith.constant 0 : index
    %0 = vector.load %arg1[%c0, %c0_0] : memref<128x32xf32, #tpu.memory_space<vmem>>, vector<128x32xf32>
    %1 = arith.truncf %0 : vector<128x32xf32> to vector<128x32xbf16>
    %c0_1 = arith.constant 0 : index
    %c0_2 = arith.constant 0 : index
    %2 = vector.load %arg2[%c0_1, %c0_2] : memref<32x512xbf16, #tpu.memory_space<vmem>>, vector<32x512xbf16>
    %cst = arith.constant dense<0.000000e+00> : vector<128x512xf32>
    %3 = tpu.matmul %1, %2, %cst {dimension_numbers = #tpu.dot_dimension_numbers<[1], [0], [0], [1], [0, 0, 1, 1], [], []>} : vector<128x32xbf16>, vector<32x512xbf16>, vector<128x512xf32> -> vector<128x512xf32>
    %c0_3 = arith.constant 0 : index
    %c0_4 = arith.constant 0 : index
    %4 = vector.load %arg3[%c0_3, %c0_4] : memref<1x512xf32, #tpu.memory_space<vmem>>, vector<1x512xf32>
    %5 = vector.broadcast %4 : vector<1x512xf32> to vector<128x512xf32>
    %6 = arith.addf %3, %5 : vector<128x512xf32>
    %cst_5 = arith.constant 0.000000e+00 : f32
    %7 = vector.broadcast %cst_5 : f32 to vector<128x512xf32>
    %8 = arith.maximumf %6, %7 : vector<128x512xf32>
    %9 = arith.truncf %8 : vector<128x512xf32> to vector<128x512xbf16>
    %c0_6 = arith.constant 0 : index
    %c0_7 = arith.constant 0 : index
    %10 = vector.load %arg4[%c0_6, %c0_7] : memref<512x384xbf16, #tpu.memory_space<vmem>>, vector<512x384xbf16>
    %cst_8 = arith.constant dense<0.000000e+00> : vector<128x384xf32>
    %11 = tpu.matmul %9, %10, %cst_8 {dimension_numbers = #tpu.dot_dimension_numbers<[1], [0], [0], [1], [0, 0, 1, 1], [], []>} : vector<128x512xbf16>, vector<512x384xbf16>, vector<128x384xf32> -> vector<128x384xf32>
    %c0_9 = arith.constant 0 : index
    %c0_10 = arith.constant 0 : index
    %12 = vector.load %arg5[%c0_9, %c0_10] : memref<1x384xf32, #tpu.memory_space<vmem>>, vector<1x384xf32>
    %13 = vector.broadcast %12 : vector<1x384xf32> to vector<128x384xf32>
    %14 = arith.addf %11, %13 : vector<128x384xf32>
    %cst_11 = arith.constant 0.000000e+00 : f32
    %15 = vector.broadcast %cst_11 : f32 to vector<128x384xf32>
    %16 = arith.maximumf %14, %15 : vector<128x384xf32>
    %17 = arith.truncf %16 : vector<128x384xf32> to vector<128x384xbf16>
    %c0_12 = arith.constant 0 : index
    %c0_13 = arith.constant 0 : index
    %18 = vector.load %arg6[%c0_12, %c0_13] : memref<384x128xbf16, #tpu.memory_space<vmem>>, vector<384x128xbf16>
    %cst_14 = arith.constant dense<0.000000e+00> : vector<128x128xf32>
    %19 = tpu.matmul %17, %18, %cst_14 {dimension_numbers = #tpu.dot_dimension_numbers<[1], [0], [0], [1], [0, 0, 1, 1], [], []>} : vector<128x384xbf16>, vector<384x128xbf16>, vector<128x128xf32> -> vector<128x128xf32>
    %c0_15 = arith.constant 0 : index
    %c0_16 = arith.constant 0 : index
    %20 = vector.load %arg7[%c0_15, %c0_16] : memref<1x128xf32, #tpu.memory_space<vmem>>, vector<1x128xf32>
    %21 = vector.broadcast %20 : vector<1x128xf32> to vector<128x128xf32>
    %22 = arith.addf %19, %21 : vector<128x128xf32>
    %23 = math.tanh %22 : vector<128x128xf32>
    %c0_17 = arith.constant 0 : index
    %c0_18 = arith.constant 0 : index
    %24 = vector.load %arg8[%c0_17, %c0_18] : memref<128x128xf32, #tpu.memory_space<vmem>>, vector<128x128xf32>
    tpu.vector_store %arg8[%c0_17, %c0_18], %23 {strides = array<i32>} : memref<128x128xf32, #tpu.memory_space<vmem>>, vector<128x128xf32>,
    return
  }
  func.func @transform_0(%arg0: i32) -> (i32, i32) {
    %c0_i32 = arith.constant 0 : i32
    %c0_i32_0 = arith.constant 0 : i32
    return %arg0, %c0_i32 : i32, i32
  }
  func.func @transform_1(%arg0: i32) -> (i32, i32) {
    %c0_i32 = arith.constant 0 : i32
    %c0_i32_0 = arith.constant 0 : i32
    %c0_i32_1 = arith.constant 0 : i32
    return %c0_i32, %c0_i32_0 : i32, i32
  }
  func.func @transform_2(%arg0: i32) -> (i32, i32) {
    %c0_i32 = arith.constant 0 : i32
    %c0_i32_0 = arith.constant 0 : i32
    %c0_i32_1 = arith.constant 0 : i32
    return %c0_i32, %c0_i32_0 : i32, i32
  }
  func.func @transform_3(%arg0: i32) -> (i32, i32) {
    %c0_i32 = arith.constant 0 : i32
    %c0_i32_0 = arith.constant 0 : i32
    %c0_i32_1 = arith.constant 0 : i32
    return %c0_i32, %c0_i32_0 : i32, i32
  }
  func.func @transform_4(%arg0: i32) -> (i32, i32) {
    %c0_i32 = arith.constant 0 : i32
    %c0_i32_0 = arith.constant 0 : i32
    %c0_i32_1 = arith.constant 0 : i32
    return %c0_i32, %c0_i32_0 : i32, i32
  }
  func.func @transform_5(%arg0: i32) -> (i32, i32) {
    %c0_i32 = arith.constant 0 : i32
    %c0_i32_0 = arith.constant 0 : i32
    %c0_i32_1 = arith.constant 0 : i32
    return %c0_i32, %c0_i32_0 : i32, i32
  }
  func.func @transform_6(%arg0: i32) -> (i32, i32) {
    %c0_i32 = arith.constant 0 : i32
    %c0_i32_0 = arith.constant 0 : i32
    %c0_i32_1 = arith.constant 0 : i32
    return %c0_i32, %c0_i32_0 : i32, i32
  }
  func.func @transform_7(%arg0: i32) -> (i32, i32) {
    %c0_i32 = arith.constant 0 : i32
    %c0_i32_0 = arith.constant 0 : i32
    return %arg0, %c0_i32 : i32, i32
  }
}

</mosaic_0001>

<bundles_post_ra>
// kernel: tpu_custom_call.1
= control target key start
LH: loop header
LB: loop body
LE: loop exit
PB: predicated region body
PF: predicated region fallthrough
CT: control target
= control target key end

     0   :  { %12 = vsyncpa [#allocation3], 0  ;;  %s3793_s0 = inlined_call_operand.vmem [shape: f32[256,32], index: 0, kind: input, shape index: {}]   ;;  %s3794_s1 = inlined_call_operand.vmem [shape: bf16[32,512], index: 1, kind: input, shape index: {}]   ;;  %s3795_s2 = inlined_call_operand.vmem [shape: f32[1,512], index: 2, kind: input, shape index: {}]   ;;  %s3796_s3 = inlined_call_operand.hbm [shape: bf16[512,384], index: 3, kind: input, shape index: {}]   ;;  %s3797_s4 = inlined_call_operand.vmem [shape: f32[1,384], index: 4, kind: input, shape index: {}]   ;;  %s3798_s5 = inlined_call_operand.vmem [shape: bf16[384,128], index: 5, kind: input, shape index: {}]   ;;  %s3799_s6 = inlined_call_operand.vmem [shape: f32[1,128], index: 6, kind: input, shape index: {}]   ;;  %s3800_s7 = inlined_call_operand.hbm [shape: f32[256,128], index: 7, kind: output, shape index: {}]  }
   0x1   :  { %13 = vsyncpa [#allocation4], 0 }
   0x2   :  { %15 = vsyncpa [#allocation4 + $0x1], 0  ;;  %s3189_s24 = smov 0   ;;  %s3191_s25 = smov 0  }
   0x3   :  { %s3193_s26 = smov 0   ;;  %s3195_s27 = smov 0  }
   0x4 LB: > { %s3210_s28 = sadd.s32 4294967295, %s3140_s27   ;;  %s2399_s29 = sadd.s32 4294967294, %s3140_s27   ;;  %s3140_s27 = sphi %s3195_s27, %s3808_s27   ;;  %s3136_s26 = sphi %s3193_s26, %s3807_s26   ;;  %s3132_s25 = sphi %s3191_s25, %s3806_s25   ;;  %s3128_s24 = sphi %s3189_s24, %s3805_s24  }
   0x5   : > { %s3214_s30 = sadd.s32 1, %s3140_s27   ;;  %s180_s8 = sadd.s32 1, %s3136_s26 }
   0x6   : > { %s177_s9 = ssub.s32 %s3140_s27, %s3214_s30  ;;  %p190_p0 = scmp.ne.s32.totalorder %s3136_s26, %s3132_s25 }
   0x7   : > { %p178_p1 = scmp.eq.s32.totalorder %s177_s9, 0  ;;  %p191_p2 = scmp.eq.s32.totalorder %s3210_s28, 1 }
   0x8   : > { %p196_p3 = scmp.ne.s32.totalorder %s3132_s25, %s3128_s24  ;;  %p197_p4 = scmp.eq.s32.totalorder %s2399_s29, 1 }
   0x9   : > { %s3225_s10 = scalar_select %p178_p1, %s3136_s26, %s180_s8  }
   0xa   : > { %p3227_p5 = por %p191_p2, %p190_p0  ;;  %p3231_p6 = por %p197_p4, %p196_p3 }
   0xb   : > { %p2400_p7 = scmp.ge.s32.totalorder %s3140_s27, 1  ;;  %p204_p8 = scmp.lt.s32.totalorder %s3140_s27, 3 }
   0xc   : > { %s3802_s12 = scalar_select %p3231_p6, 1, 0 }
   0xd   : > { %p2813_p9 = scmp.eq.s32.totalorder %s3210_s28, 0  ;;  %p3238_p10 = pnand %p2400_p7, %p204_p8 }
   0xe   : > { %s3142_s14 = smov [#allocation2]  }
   0xf   : > { %s222_s15 = sshll.u32 %s3142_s14, 4  ;;  %p2805_p11 = pneg %p3238_p10  ;;  %s223_s15 = int_to_ptr.vmem [resolvable:$true] %s222_s15 }
  0x10   : > { %s3061_s16 = scalar_lea.vmem %s223_s15, 12288  ;;  %p3069_p3 = scmp.lt.s32.totalorder %s223_s15, %s223_s15 }
  0x11   : > { %p2806_p12 = pnand %p2813_p9, %p2805_p11  ;;  %p3062_p0 = scmp.ne.s32.totalorder %s223_s15, %s3061_s16 }
  0x12   : > { %p3070_p4 = scmp.lt.s32.totalorder %s3061_s16, %s3061_s16 }
  0x13   : > { %p3052_p13 = pneg %p2806_p12 }
  0x14   : > { %p3071_p6 = por %p3070_p4, %p3069_p3 }
  0x15   : > { %p3064_p1 = pnand %p3062_p0, %p3052_p13 }
  0x17   : > { %p3065_p2 = pneg %p3064_p1 }
  0x19   : > { %p3072_p7 = pnand %p3071_p6, %p3065_p2 }
  0x1b   : > { %3075 = shalt.err (!%p3072_p7)
}
  0x1c   : > { %s3143_s17 = smov 192   ;;  %s3144_s18 = smov 12  }
  0x1d   : > { %2808 = dma.hbm_to_vmem [thread:$0]  (!%p2806_p12), %s3796_s3, 12288, %s223_s15, [#allocation3], %s3143_s17, %s3143_s17, %s3144_s18  }
  0x1e   : > { %256 = sbr.rel (%p3238_p10) target bundleno = 810 (0x32a), region = 48 }
  0x23   : > { %3119 = dma.done.wait (%p2813_p9), [#allocation3], 12288  }
  0x24   : > { %3121 = vsyncadd (%p2813_p9), [#allocation3], 4294955008  ;;  %s2406_s21 = sshll.u32 %s3210_s28, 4  ;;  %v3145_v0 = vmov 0   ;;  %v2854_v1 = vld [vmem:[%s3794_s1 + $0x24] ss:$16 sps:$4 sm:$0xff]  }
  0x25   : > { %447 = vmatprep.mubr.bf16.mxu0 %v3145_v0  ;;  %560 = vmatprep.mubr.bf16.mxu1 %v3145_v0  ;;  %p289_p6 = scmp.lt.s32.totalorder %s2406_s21, 31  ;;  %v2856_v2 = vld [vmem:[%s3794_s1 + $0x2c] ss:$16 sps:$4 sm:$0xff]   ;;  %v2858_v3 = vld [vmem:[%s3794_s1 + $0x20] ss:$16 sps:$4 sm:$0xff]   ;;  %vm390_vm0 = vcmask 261120  }
  0x26   : > { %427 = vmatprep.subr.bf16.mxu0 %v2854_v1  ;;  %v2859_v4 = vld [vmem:[%s3794_s1 + $0x28] ss:$16 sps:$4 sm:$0xff]   ;;  %540 = vmatprep.subr.bf16.mxu1 %v2856_v2  ;;  %v2860_v5 = vld [vmem:[%s3794_s1 + $0x4] ss:$16 sps:$4 sm:$0xff]   ;;  %v2862_v6 = vld [vmem:[%s3794_s1 + $0xc] ss:$16 sps:$4 sm:$0xff]  }
  0x27   : > { %s3810_s21 = smov (!%p289_p6, %s2406_s21), 31  ;;  %428 = vmatpush1.bf16.msra.mxu0 %v2858_v3  ;;  %541 = vmatpush1.bf16.msra.mxu1 %v2859_v4  ;;  %v2864_v7 = vld [vmem:[%s3794_s1] ss:$16 sps:$4 sm:$0xff]   ;;  %v2865_v8 = vld [vmem:[%s3794_s1 + $0x8] ss:$16 sps:$4 sm:$0xff]   ;;  %s2558_s15 = sshll.u32 %s3210_s28, 11 }
  0x28   : > { %s2407_s22 = sshll.u32 %s3810_s21, 3  ;;  %429 = vmatprep.subr.bf16.mxu0 %v2860_v5  ;;  %542 = vmatprep.subr.bf16.mxu1 %v2862_v6  ;;  %v2866_v14 = vld [vmem:[#allocation2 + $0xa8] ss:$12 sps:$4 sm:$0xff]   ;;  %v2868_v15 = vld [vmem:[#allocation2 + $0xac] ss:$12 sps:$4 sm:$0xff]   ;;  %s3146_s21 = smov [#allocation5]  }
  0x29   : > { %s3273_s19 = scalar_lea.vmem %s3793_s0, %s2407_s22  ;;  %v2869_v16 = vld [vmem:[#allocation2 + $0x228] ss:$12 sps:$4 sm:$0xff]   ;;  %v2871_v17 = vld [vmem:[#allocation2 + $0x22c] ss:$12 sps:$4 sm:$0xff]   ;;  %v2872_v18 = vld [vmem:[#allocation2 + $0x90] ss:$12 sps:$4 sm:$0xff]  }
  0x2a   : > { %v296_v9 = vld [vmem:[%s3273_s19] sm:$0xff]  ;;  %v297_v10 = vld [vmem:[%s3273_s19 + $0x8] sm:$0xff]  ;;  %v298_v12 = vld [vmem:[%s3273_s19 + $0x10] sm:$0xff]  ;;  %s285_s22 = sand.u32 1, %s3132_s25   ;;  %s3080_s23 = sshll.u32 %s3146_s21, 4  ;;  %s3081_s23 = int_to_ptr.vmem [resolvable:$false] %s3080_s23 }
  0x2b   : > { %v312_v11 = vpack.c.bf16 %v297_v10, %v296_v9  ;;  %430 = vmatpush1.bf16.msra.mxu0 %v2864_v7  ;;  %543 = vmatpush1.bf16.msra.mxu1 %v2865_v8  ;;  %v299_v13 = vld [vmem:[%s3273_s19 + $0x18] sm:$0xff]  ;;  %v2874_v19 = vld [vmem:[#allocation2 + $0x94] ss:$12 sps:$4 sm:$0xff]   ;;  %v2886_v27 = vld [vmem:[#allocation2 + $0x64] ss:$12 sps:$4 sm:$0xff]   ;;  %s2405_s13 = sshll.u32 %s285_s22, 7 }
  0x2c   : > { %1394 = vmatprep.subr.bf16.mxu0 %v2868_v15  ;;  %v313_v20 = vpack.c.bf16 %v299_v13, %v298_v12  ;;  %1507 = vmatprep.subr.bf16.mxu1 %v2871_v17  ;;  %v2877_v21 = vld [vmem:[#allocation2 + $0x214] ss:$12 sps:$4 sm:$0xff]   ;;  %v2875_v22 = vld [vmem:[#allocation2 + $0x210] ss:$12 sps:$4 sm:$0xff]   ;;  %v2878_v24 = vld [vmem:[#allocation2 + $0x78] ss:$12 sps:$4 sm:$0xff]  }
  0x2d   : > { %v2880_v23 = vld [vmem:[#allocation2 + $0x7c] ss:$12 sps:$4 sm:$0xff]   ;;  %v300_v26 = vld [vmem:[%s3273_s19 + $0x20] sm:$0xff]  ;;  %v2892_v34 = vld [vmem:[#allocation2 + $0x4c] ss:$12 sps:$4 sm:$0xff]   ;;  %s3709_s14 = scalar_lea.vmem [#allocation5], %s2405_s13 }
  0x2e   : > { %2416 = vmatmul.mubr.msk.bf16.vlgmr.msra.gmra.mxu0 %vm390_vm0, %v312_v11  ;;  %2424 = vmatmul.mubr.msk.bf16.vlgmr.msra.gmra.mxu1 %vm390_vm0, %v312_v11  ;;  %v2883_v25 = vld [vmem:[#allocation2 + $0x1fc] ss:$12 sps:$4 sm:$0xff]   ;;  %v2881_v29 = vld [vmem:[#allocation2 + $0x1f8] ss:$12 sps:$4 sm:$0xff]   ;;  %v2884_v30 = vld [vmem:[#allocation2 + $0x60] ss:$12 sps:$4 sm:$0xff]  }
  0x2f   : > { %457 = vmatprep.mubr.bf16.mxu0 %v3145_v0  ;;  %570 = vmatprep.mubr.bf16.mxu1 %v3145_v0  ;;  %v301_v28 = vld [vmem:[%s3273_s19 + $0x28] sm:$0xff]  ;;  %v2889_v31 = vld [vmem:[#allocation2 + $0x1e4] ss:$12 sps:$4 sm:$0xff]   ;;  %v2898_v38 = vld [vmem:[#allocation2 + $0x34] ss:$12 sps:$4 sm:$0xff]   ;;  %s2325_s16 = sshll.u32 %s3709_s14, 4  ;;  %s3747_s16 = int_to_ptr.vmem [resolvable:$true] %s2325_s16 }
  0x30   : > { %1395 = vmatpush1.bf16.msra.mxu0 %v2866_v14  ;;  %1508 = vmatpush1.bf16.msra.mxu1 %v2869_v16  ;;  %v314_v32 = vpack.c.bf16 %v301_v28, %v300_v26  ;;  %v2887_v33 = vld [vmem:[#allocation2 + $0x1e0] ss:$12 sps:$4 sm:$0xff]   ;;  %v2890_v35 = vld [vmem:[#allocation2 + $0x48] ss:$12 sps:$4 sm:$0xff]   ;;  %v303_v39 = vld [vmem:[%s3273_s19 + $0x38] sm:$0xff]  ;;  %s3753_s20 = scalar_lea.sflag [#allocation4], %s285_s22  ;;  %p3083_p11 = scmp.lt.s32.totalorder %s3747_s16, %s3081_s23 }
  0x31   : > { %1396 = vmatprep.subr.bf16.mxu0 %v2874_v19  ;;  %1509 = vmatprep.subr.bf16.mxu1 %v2877_v21  ;;  %v2895_v36 = vld [vmem:[#allocation2 + $0x1cc] ss:$12 sps:$4 sm:$0xff]   ;;  %v302_v37 = vld [vmem:[%s3273_s19 + $0x30] sm:$0xff]  ;;  %v2904_v45 = vld [vmem:[#allocation2 + $0x1c] ss:$12 sps:$4 sm:$0xff]   ;;  %s3076_s28 = scalar_lea.vmem %s3747_s16, 2048 }
  0x32   : > { %v2893_v40 = vld [vmem:[#allocation2 + $0x1c8] ss:$12 sps:$4 sm:$0xff]   ;;  %v2896_v41 = vld [vmem:[#allocation2 + $0x30] ss:$12 sps:$4 sm:$0xff]   ;;  %v315_v43 = vpack.c.bf16 %v303_v39, %v302_v37  ;;  %v2902_v46 = vld [vmem:[#allocation2 + $0x18] ss:$12 sps:$4 sm:$0xff]   ;;  %p3077_p8 = scmp.ne.s32.totalorder %s3747_s16, %s3076_s28 }
  0x33   : > { %v2901_v42 = vld [vmem:[#allocation2 + $0x1b4] ss:$12 sps:$4 sm:$0xff]   ;;  %v2899_v44 = vld [vmem:[#allocation2 + $0x1b0] ss:$12 sps:$4 sm:$0xff]   ;;  %v305_v50 = vld [vmem:[%s3273_s19 + $0x48] sm:$0xff]  ;;  %s3082_s29 = scalar_lea.vmem %s3081_s23, 4096 }
  0x34   : > { %1397 = vmatpush1.bf16.msra.mxu0 %v2872_v18  ;;  %1510 = vmatpush1.bf16.msra.mxu1 %v2875_v22  ;;  %v2907_v47 = vld [vmem:[#allocation2 + $0x19c] ss:$12 sps:$4 sm:$0xff]   ;;  %v304_v48 = vld [vmem:[%s3273_s19 + $0x40] sm:$0xff]  ;;  %v2916_v56 = vld [vmem:[#allocation2 + $0x16c] ss:$12 sps:$4 sm:$0xff]   ;;  %p3078_p9 = pnand %p3077_p8, %p3227_p5  ;;  %p3084_p12 = scmp.lt.s32.totalorder %s3082_s29, %s3076_s28 }
  0x35   : > { %1398 = vmatprep.subr.bf16.mxu0 %v2880_v23  ;;  %1511 = vmatprep.subr.bf16.mxu1 %v2883_v25  ;;  %v2910_v49 = vld [vmem:[#allocation2 + $0x4] ss:$12 sps:$4 sm:$0xff]   ;;  %v2908_v52 = vld [vmem:[#allocation2] ss:$12 sps:$4 sm:$0xff]   ;;  %v316_v54 = vpack.c.bf16 %v305_v50, %v304_v48  ;;  %v2914_v58 = vld [vmem:[#allocation2 + $0x168] ss:$12 sps:$4 sm:$0xff]  }
  0x36   : > { %2417 = vmatmul.mubr.msk.bf16.gmra.mxu0 %vm390_vm0, %v313_v20  ;;  %2425 = vmatmul.mubr.msk.bf16.gmra.mxu1 %vm390_vm0, %v313_v20  ;;  %v2905_v51 = vld [vmem:[#allocation2 + $0x198] ss:$12 sps:$4 sm:$0xff]   ;;  %v2911_v55 = vld [vmem:[#allocation2 + $0x180] ss:$12 sps:$4 sm:$0xff]   ;;  %v306_v57 = vld [vmem:[%s3273_s19 + $0x50] sm:$0xff]  ;;  %p3079_p10 = pneg %p3078_p9  ;;  %p3085_p13 = por %p3084_p12, %p3083_p11 }
  0x37   : > { %467 = vmatprep.mubr.bf16.mxu0 %v3145_v0  ;;  %580 = vmatprep.mubr.bf16.mxu1 %v3145_v0  ;;  %v2913_v53 = vld [vmem:[#allocation2 + $0x184] ss:$12 sps:$4 sm:$0xff]   ;;  %v2919_v59 = vld [vmem:[#allocation2 + $0x2ec] ss:$12 sps:$4 sm:$0xff]   ;;  %v2922_v61 = vld [vmem:[#allocation2 + $0x154] ss:$12 sps:$4 sm:$0xff]  }
  0x38   : > { %1399 = vmatpush1.bf16.msra.mxu0 %v2878_v24  ;;  %1512 = vmatpush1.bf16.msra.mxu1 %v2881_v29  ;;  %v307_v60 = vld [vmem:[%s3273_s19 + $0x58] sm:$0xff]  ;;  %v2917_v62 = vld [vmem:[#allocation2 + $0x2e8] ss:$12 sps:$4 sm:$0xff]   ;;  %v2934_v7 = vld [vmem:[#allocation2 + $0x124] ss:$12 sps:$4 sm:$0xff]   ;;  %p3086_p0 = pnand %p3085_p13, %p3079_p10 }
  0x39   : > { %1400 = vmatprep.subr.bf16.mxu0 %v2886_v27  ;;  %1513 = vmatprep.subr.bf16.mxu1 %v2889_v31  ;;  %v2920_v63 = vld [vmem:[#allocation2 + $0x150] ss:$12 sps:$4 sm:$0xff]   ;;  %v2925_v1 = vld [vmem:[#allocation2 + $0x2d4] ss:$12 sps:$4 sm:$0xff]   ;;  %v317_v2 = vpack.c.bf16 %v307_v60, %v306_v57  ;;  %v2926_v5 = vld [vmem:[#allocation2 + $0x138] ss:$12 sps:$4 sm:$0xff]  }
  0x3a   : > { %v2923_v3 = vld [vmem:[#allocation2 + $0x2d0] ss:$12 sps:$4 sm:$0xff]   ;;  %v308_v8 = vld [vmem:[%s3273_s19 + $0x60] sm:$0xff]  ;;  %v309_v9 = vld [vmem:[%s3273_s19 + $0x68] sm:$0xff] }
  0x3b   : > { %v2928_v4 = vld [vmem:[#allocation2 + $0x13c] ss:$12 sps:$4 sm:$0xff]   ;;  %v2929_v10 = vld [vmem:[#allocation2 + $0x2b8] ss:$12 sps:$4 sm:$0xff]   ;;  %v2932_v11 = vld [vmem:[#allocation2 + $0x120] ss:$12 sps:$4 sm:$0xff]   ;;  %v318_v13 = vpack.c.bf16 %v309_v9, %v308_v8 }
  0x3c   : > { %1401 = vmatpush1.bf16.msra.mxu0 %v2884_v30  ;;  %1514 = vmatpush1.bf16.msra.mxu1 %v2887_v33  ;;  %v2931_v6 = vld [vmem:[#allocation2 + $0x2bc] ss:$12 sps:$4 sm:$0xff]   ;;  %v2937_v12 = vld [vmem:[#allocation2 + $0x2a4] ss:$12 sps:$4 sm:$0xff]   ;;  %v2935_v14 = vld [vmem:[#allocation2 + $0x2a0] ss:$12 sps:$4 sm:$0xff]  }
  0x3d   : > { %1402 = vmatprep.subr.bf16.mxu0 %v2892_v34  ;;  %1515 = vmatprep.subr.bf16.mxu1 %v2895_v36  ;;  %v2940_v15 = vld [vmem:[#allocation2 + $0x10c] ss:$12 sps:$4 sm:$0xff]   ;;  %v2938_v16 = vld [vmem:[#allocation2 + $0x108] ss:$12 sps:$4 sm:$0xff]   ;;  %v2944_v24 = vld [vmem:[#allocation2 + $0xf0] ss:$12 sps:$4 sm:$0xff]  }
  0x3e   : > { %2418 = vmatmul.mubr.msk.bf16.gmra.mxu0 %vm390_vm0, %v314_v32  ;;  %2426 = vmatmul.mubr.msk.bf16.gmra.mxu1 %vm390_vm0, %v314_v32  ;;  %v2943_v17 = vld [vmem:[#allocation2 + $0x28c] ss:$12 sps:$4 sm:$0xff]   ;;  %v310_v18 = vld [vmem:[%s3273_s19 + $0x70] sm:$0xff]  ;;  %v2952_v26 = vld [vmem:[#allocation2 + $0xdc] ss:$12 sps:$4 sm:$0xff]  }
  0x3f   : > { %477 = vmatprep.mubr.bf16.mxu0 %v3145_v0  ;;  %590 = vmatprep.mubr.bf16.mxu1 %v3145_v0  ;;  %v311_v19 = vld [vmem:[%s3273_s19 + $0x78] sm:$0xff]  ;;  %v2941_v20 = vld [vmem:[#allocation2 + $0x288] ss:$12 sps:$4 sm:$0xff]   ;;  %v2958_v29 = vld [vmem:[#allocation2 + $0xc4] ss:$12 sps:$4 sm:$0xff]   ;;  %s3745_s19 = scalar_lea.hbm %s3800_s7, %s2558_s15 }
  0x40   : > { %1403 = vmatpush1.bf16.msra.mxu0 %v2890_v35  ;;  %1516 = vmatpush1.bf16.msra.mxu1 %v2893_v40  ;;  %v319_v21 = vpack.c.bf16 %v311_v19, %v310_v18  ;;  %v2946_v22 = vld [vmem:[#allocation2 + $0xf4] ss:$12 sps:$4 sm:$0xff]   ;;  %v2947_v25 = vld [vmem:[#allocation2 + $0x270] ss:$12 sps:$4 sm:$0xff]   ;;  %v2950_v27 = vld [vmem:[#allocation2 + $0xd8] ss:$12 sps:$4 sm:$0xff]   ;;  %v330_v35 = vlaneseq }
  0x41   : > { %1404 = vmatprep.subr.bf16.mxu0 %v2898_v38  ;;  %1517 = vmatprep.subr.bf16.mxu1 %v2901_v42  ;;  %v2949_v23 = vld [vmem:[#allocation2 + $0x274] ss:$12 sps:$4 sm:$0xff]   ;;  %v2953_v28 = vld [vmem:[#allocation2 + $0x258] ss:$12 sps:$4 sm:$0xff]   ;;  %v2962_v33 = vld [vmem:[#allocation2 + $0x170] ss:$12 sps:$4 sm:$0xff]  }
  0x42   : > { %v2961_v30 = vld [vmem:[#allocation2 + $0x244] ss:$12 sps:$4 sm:$0xff]   ;;  %v2956_v31 = vld [vmem:[#allocation2 + $0xc0] ss:$12 sps:$4 sm:$0xff]   ;;  %v3333_v36 = vshrl.u32 %v330_v35, 7 }
  0x43   : > { %v2959_v32 = vld [vmem:[#allocation2 + $0x240] ss:$12 sps:$4 sm:$0xff]   ;;  %v2964_v34 = vld [vmem:[#allocation2 + $0x2f0] ss:$12 sps:$4 sm:$0xff]   ;;  %v2969_v35 = vld [vmem:[#allocation2 + $0x218] ss:$12 sps:$4 sm:$0xff]  }
  0x44   : > { %1405 = vmatpush1.bf16.msra.mxu0 %v2896_v41  ;;  %1518 = vmatpush1.bf16.msra.mxu1 %v2899_v44  ;;  %v336_v37 = vsub.s32 1, %v3333_v36  ;;  %v344_v38 = vsub.s32 3, %v3333_v36  ;;  %v332_v39 = vsub.s32 0, %v3333_v36  ;;  %v340_v40 = vsub.s32 2, %v3333_v36  ;;  %v328_v41 = vld [vmem:[%s3795_s2] sm:$0xf] }
  0x45   : > { %1406 = vmatprep.subr.bf16.mxu0 %v2904_v45  ;;  %1519 = vmatprep.subr.bf16.mxu1 %v2907_v47 }
  0x46   : > { %2419 = vmatmul.mubr.msk.bf16.gmra.mxu0 %vm390_vm0, %v315_v43  ;;  %2427 = vmatmul.mubr.msk.bf16.gmra.mxu1 %vm390_vm0, %v315_v43  ;;  %v3344_v44 = vrot.slane %v328_v41, %v336_v37  ;;  %v3346_v45 = vrot.slane %v328_v41, %v344_v38  ;;  %v3354_v47 = vrot.slane %v328_v41, %v340_v40  ;;  %v2970_v38 = vld [vmem:[#allocation2 + $0x140] ss:$12 sps:$4 sm:$0xff]  }
  0x47   : > { %487 = vmatprep.mubr.bf16.mxu0 %v3145_v0  ;;  %600 = vmatprep.mubr.bf16.mxu1 %v3145_v0 }
  0x48   : > { %1407 = vmatpush1.bf16.msra.mxu0 %v2902_v46  ;;  %1520 = vmatpush1.bf16.msra.mxu1 %v2905_v51  ;;  %v3350_v46 = vrot.slane %v328_v41, %v332_v39 }
  0x49   : > { %1408 = vmatprep.subr.bf16.mxu0 %v2910_v49  ;;  %1521 = vmatprep.subr.bf16.mxu1 %v2913_v53 }
  0x4c   : > { %1409 = vmatpush1.bf16.msra.mxu0 %v2908_v52  ;;  %1522 = vmatpush1.bf16.msra.mxu1 %v2911_v55 }
  0x4d   : > { %1410 = vmatprep.subr.bf16.mxu0 %v2916_v56  ;;  %1523 = vmatprep.subr.bf16.mxu1 %v2919_v59 }
  0x4e   : > { %2420 = vmatmul.mubr.msk.bf16.gmra.mxu0 %vm390_vm0, %v316_v54  ;;  %2428 = vmatmul.mubr.msk.bf16.gmra.mxu1 %vm390_vm0, %v316_v54 }
  0x4f   : > { %497 = vmatprep.mubr.bf16.mxu0 %v3145_v0  ;;  %610 = vmatprep.mubr.bf16.mxu1 %v3145_v0 }
  0x50   : > { %1411 = vmatpush2.bf16.msra.mxu0 %v2914_v58  ;;  %1524 = vmatpush2.bf16.msra.mxu1 %v2917_v62 }
  0x51   : > { %1412 = vmatprep.subr.bf16.mxu0 %v2922_v61  ;;  %1525 = vmatprep.subr.bf16.mxu1 %v2925_v1 }
  0x54   : > { %1413 = vmatpush2.bf16.msra.mxu0 %v2920_v63  ;;  %1526 = vmatpush2.bf16.msra.mxu1 %v2923_v3 }
  0x55   : > { %1414 = vmatprep.subr.bf16.mxu0 %v2928_v4  ;;  %1527 = vmatprep.subr.bf16.mxu1 %v2931_v6 }
  0x56   : > { %2421 = vmatmul.mubr.msk.bf16.gmra.mxu0 %vm390_vm0, %v317_v2  ;;  %2429 = vmatmul.mubr.msk.bf16.gmra.mxu1 %vm390_vm0, %v317_v2 }
  0x57   : > { %507 = vmatprep.mubr.bf16.mxu0 %v3145_v0  ;;  %620 = vmatprep.mubr.bf16.mxu1 %v3145_v0 }
  0x58   : > { %1415 = vmatpush2.bf16.msra.mxu0 %v2926_v5  ;;  %1528 = vmatpush2.bf16.msra.mxu1 %v2929_v10 }
  0x59   : > { %1416 = vmatprep.subr.bf16.mxu0 %v2934_v7  ;;  %1529 = vmatprep.subr.bf16.mxu1 %v2937_v12 }
  0x5c   : > { %1417 = vmatpush2.bf16.msra.mxu0 %v2932_v11  ;;  %1530 = vmatpush2.bf16.msra.mxu1 %v2935_v14  ;;  %v2965_v14 = vld [vmem:[#allocation2 + $0x230] ss:$12 sps:$4 sm:$0xff]  }
  0x5d   : > { %1418 = vmatprep.subr.bf16.mxu0 %v2940_v15  ;;  %1531 = vmatprep.subr.bf16.mxu1 %v2943_v17 }
  0x5e   : > { %2422 = vmatmul.mubr.msk.bf16.gmra.mxu0 %vm390_vm0, %v318_v13  ;;  %2430 = vmatmul.mubr.msk.bf16.gmra.mxu1 %vm390_vm0, %v318_v13  ;;  %v2963_v13 = vld [vmem:[#allocation2 + $0xb0] ss:$12 sps:$4 sm:$0xff]  }
  0x5f   : > { %517 = vmatprep.mubr.bf16.mxu0 %v3145_v0  ;;  %630 = vmatprep.mubr.bf16.mxu1 %v3145_v0  ;;  %v2955_v0 = vld [vmem:[#allocation2 + $0x25c] ss:$12 sps:$4 sm:$0xff]  }
  0x60   : > { %1419 = vmatpush2.bf16.msra.mxu0 %v2938_v16  ;;  %1532 = vmatpush2.bf16.msra.mxu1 %v2941_v20  ;;  %v2966_v20 = vld [vmem:[#allocation2 + $0x158] ss:$12 sps:$4 sm:$0xff]  }
  0x61   : > { %1420 = vmatprep.subr.bf16.mxu0 %v2946_v22  ;;  %1533 = vmatprep.subr.bf16.mxu1 %v2949_v23 }
  0x64   : > { %1421 = vmatpush2.bf16.msra.mxu0 %v2944_v24  ;;  %1534 = vmatpush2.bf16.msra.mxu1 %v2947_v25 }
  0x65   : > { %1422 = vmatprep.subr.bf16.mxu0 %v2952_v26  ;;  %1535 = vmatprep.subr.bf16.mxu1 %v2955_v0 }
  0x66   : > { %2423 = vmatmul.mubr.msk.bf16.gmra.mxu0 %vm390_vm0, %v319_v21  ;;  %2431 = vmatmul.mubr.msk.bf16.gmra.mxu1 %vm390_vm0, %v319_v21  ;;  %v2968_v21 = vld [vmem:[#allocation2 + $0x2d8] ss:$12 sps:$4 sm:$0xff]  }
  0x68   : > { %1423 = vmatpush2.bf16.msra.mxu0 %v2950_v27  ;;  %1536 = vmatpush2.bf16.msra.mxu1 %v2953_v28 }
  0x69   : > { %1424 = vmatprep.subr.bf16.mxu0 %v2958_v29  ;;  %1537 = vmatprep.subr.bf16.mxu1 %v2961_v30  ;;  %v2967_v30 = vld [vmem:[#allocation2 + $0x98] ss:$12 sps:$4 sm:$0xff]  }
  0x6c   : > { %1425 = vmatpush2.bf16.msra.mxu0 %v2956_v31  ;;  %1538 = vmatpush2.bf16.msra.mxu1 %v2959_v32 }
  0x6d   : > { %2559 = vmatprep.subr.bf16.mxu0 %v2962_v33  ;;  %2623 = vmatprep.subr.bf16.mxu1 %v2964_v34 }
  0xee   : > { %v449_v42 = vpop.f32.mrf.mxu0  ;;  %v562_v43 = vpop.f32.mrf.mxu1 }
  0xef   : > { %v450_v56 = vadd.f32 %v449_v42, %v3350_v46  ;;  %v563_v57 = vadd.f32 %v562_v43, %v3354_v47 }
  0xf0   : > { %v451_v48 = vpop.f32.mrf.mxu0  ;;  %v564_v49 = vpop.f32.mrf.mxu1 }
  0xf1   : > { %v452_v52 = vadd.f32 %v451_v48, %v3344_v44  ;;  %v565_v53 = vadd.f32 %v564_v49, %v3346_v45  ;;  %v641_v7 = vmax.f32 %v450_v56, 0.0  ;;  %v643_v8 = vmax.f32 %v563_v57, 0.0  ;;  %v2972_v56 = vld [vmem:[#allocation2 + $0x2c0] ss:$12 sps:$4 sm:$0xff]  }
  0xf2   : > { %v453_v50 = vpop.f32.mrf.mxu0  ;;  %v566_v51 = vpop.f32.mrf.mxu1 }
  0xf3   : > { %v454_v54 = vadd.f32 %v453_v50, %v3350_v46  ;;  %v567_v55 = vadd.f32 %v566_v51, %v3354_v47  ;;  %v642_v3 = vmax.f32 %v452_v52, 0.0  ;;  %v644_v4 = vmax.f32 %v565_v53, 0.0 }
  0xf4   : > { %v455_v58 = vpop.f32.mrf.mxu0  ;;  %v568_v59 = vpop.f32.mrf.mxu1 }
  0xf5   : > { %v456_v60 = vadd.f32 %v455_v58, %v3344_v44  ;;  %v569_v61 = vadd.f32 %v568_v59, %v3346_v45  ;;  %v645_v62 = vmax.f32 %v454_v54, 0.0  ;;  %v647_v63 = vmax.f32 %v567_v55, 0.0  ;;  %v2971_v55 = vld [vmem:[#allocation2 + $0x80] ss:$12 sps:$4 sm:$0xff]  }
  0xf6   : > { %v459_v1 = vpop.f32.mrf.mxu0  ;;  %v572_v2 = vpop.f32.mrf.mxu1 }
  0xf7   : > { %v646_v5 = vmax.f32 %v456_v60, 0.0  ;;  %v648_v6 = vmax.f32 %v569_v61, 0.0  ;;  %v3368_v15 = vpack.c.bf16 %v645_v62, %v641_v7  ;;  %v3370_v16 = vpack.c.bf16 %v647_v63, %v643_v8  ;;  %v2973_v62 = vld [vmem:[#allocation2 + $0x200] ss:$12 sps:$4 sm:$0xff]   ;;  %v2974_v63 = vld [vmem:[#allocation2 + $0x128] ss:$12 sps:$4 sm:$0xff]  }
  0xf8   : > { %v461_v9 = vpop.f32.mrf.mxu0  ;;  %v574_v10 = vpop.f32.mrf.mxu1  ;;  %v460_v25 = vadd.f32 %v459_v1, %v3350_v46  ;;  %v573_v26 = vadd.f32 %v572_v2, %v3354_v47 }
  0xf9   : > { %v3364_v11 = vpack.c.bf16 %v648_v6, %v644_v4  ;;  %v3366_v12 = vpack.c.bf16 %v646_v5, %v642_v3  ;;  %v462_v17 = vadd.f32 %v461_v9, %v3344_v44  ;;  %v575_v22 = vadd.f32 %v574_v10, %v3346_v45  ;;  %v2976_v4 = vld [vmem:[#allocation2 + $0x2a8] ss:$12 sps:$4 sm:$0xff]  }
  0xfa   : > { %v463_v18 = vpop.f32.mrf.mxu0  ;;  %v576_v19 = vpop.f32.mrf.mxu1  ;;  %v649_v49 = vmax.f32 %v460_v25, 0.0  ;;  %v651_v50 = vmax.f32 %v573_v26, 0.0 }
  0xfb   : > { %v464_v23 = vadd.f32 %v463_v18, %v3350_v46  ;;  %v577_v24 = vadd.f32 %v576_v19, %v3354_v47  ;;  %1426 = vmatprep.mubr.bf16.mxu0 %v3366_v12  ;;  %1539 = vmatprep.mubr.bf16.mxu1 %v3364_v11  ;;  %v650_v41 = vmax.f32 %v462_v17, 0.0  ;;  %v652_v42 = vmax.f32 %v575_v22, 0.0 }
  0xfc   : > { %v465_v0 = vpop.f32.mrf.mxu0  ;;  %v578_v27 = vpop.f32.mrf.mxu1  ;;  %1427 = vmatmul.mubr.bf16.vlgmr.msra.gmra.mxu0 %v3368_v15  ;;  %1540 = vmatmul.mubr.bf16.vlgmr.msra.gmra.mxu1 %v3370_v16 }
  0xfd   : > { %v466_v28 = vadd.f32 %v465_v0, %v3344_v44  ;;  %v579_v29 = vadd.f32 %v578_v27, %v3346_v45  ;;  %2560 = vmatpush3.bf16.msra.mxu0 %v2963_v13  ;;  %2624 = vmatpush3.bf16.msra.mxu1 %v2965_v14  ;;  %v653_v31 = vmax.f32 %v464_v23, 0.0  ;;  %v655_v32 = vmax.f32 %v577_v24, 0.0  ;;  %v2975_v13 = vld [vmem:[#allocation2 + $0x68] ss:$12 sps:$4 sm:$0xff]  }
  0xfe   : > { %v469_v33 = vpop.f32.mrf.mxu0  ;;  %v582_v34 = vpop.f32.mrf.mxu1  ;;  %2561 = vmatprep.subr.bf16.mxu0 %v2966_v20  ;;  %2625 = vmatprep.subr.bf16.mxu1 %v2968_v21  ;;  %v2977_v20 = vld [vmem:[#allocation2 + $0x1e8] ss:$12 sps:$4 sm:$0xff]   ;;  %v2978_v21 = vld [vmem:[#allocation2 + $0x110] ss:$12 sps:$4 sm:$0xff]  }
  0xff   : > { %v654_v43 = vmax.f32 %v466_v28, 0.0  ;;  %v656_v48 = vmax.f32 %v579_v29, 0.0  ;;  %v3388_v57 = vpack.c.bf16 %v653_v31, %v649_v49  ;;  %v3390_v58 = vpack.c.bf16 %v655_v32, %v651_v50  ;;  %v2979_v31 = vld [vmem:[#allocation2 + $0x50] ss:$12 sps:$4 sm:$0xff]  }
 0x100   : > { %v471_v51 = vpop.f32.mrf.mxu0  ;;  %v584_v52 = vpop.f32.mrf.mxu1  ;;  %v470_v5 = vadd.f32 %v469_v33, %v3350_v46  ;;  %v583_v6 = vadd.f32 %v582_v34, %v3354_v47  ;;  %v2980_v32 = vld [vmem:[#allocation2 + $0x290] ss:$12 sps:$4 sm:$0xff]  }
 0x101   : > { %v3384_v53 = vpack.c.bf16 %v656_v48, %v652_v42  ;;  %v3386_v54 = vpack.c.bf16 %v654_v43, %v650_v41  ;;  %2562 = vmatpush3.bf16.msra.mxu0 %v2967_v30  ;;  %v472_v59 = vadd.f32 %v471_v51, %v3344_v44  ;;  %2626 = vmatpush3.bf16.msra.mxu1 %v2969_v35  ;;  %v2981_v42 = vld [vmem:[#allocation2 + $0x1d0] ss:$12 sps:$4 sm:$0xff]   ;;  %v2982_v43 = vld [vmem:[#allocation2 + $0xf8] ss:$12 sps:$4 sm:$0xff]  }
 0x102   : > { %v473_v60 = vpop.f32.mrf.mxu0  ;;  %v586_v61 = vpop.f32.mrf.mxu1  ;;  %2563 = vmatprep.subr.bf16.mxu0 %v2970_v38  ;;  %v585_v1 = vadd.f32 %v584_v52, %v3346_v45  ;;  %2627 = vmatprep.subr.bf16.mxu1 %v2972_v56  ;;  %v657_v26 = vmax.f32 %v470_v5, 0.0  ;;  %v659_v0 = vmax.f32 %v583_v6, 0.0  ;;  %v2984_v51 = vld [vmem:[#allocation2 + $0x278] ss:$12 sps:$4 sm:$0xff]   ;;  %v2986_v5 = vld [vmem:[#allocation2 + $0xe0] ss:$12 sps:$4 sm:$0xff]  }
 0x103   : > { %v474_v2 = vadd.f32 %v473_v60, %v3350_v46  ;;  %v587_v3 = vadd.f32 %v586_v61, %v3354_v47  ;;  %1436 = vmatprep.mubr.bf16.mxu0 %v3386_v54  ;;  %1549 = vmatprep.mubr.bf16.mxu1 %v3384_v53  ;;  %v658_v22 = vmax.f32 %v472_v59, 0.0 }
 0x104   : > { %v475_v7 = vpop.f32.mrf.mxu0  ;;  %v588_v8 = vpop.f32.mrf.mxu1  ;;  %1437 = vmatmul.mubr.bf16.gmra.mxu0 %v3388_v57  ;;  %1550 = vmatmul.mubr.bf16.gmra.mxu1 %v3390_v58  ;;  %v660_v23 = vmax.f32 %v585_v1, 0.0 }
 0x105   : > { %v476_v9 = vadd.f32 %v475_v7, %v3344_v44  ;;  %v589_v10 = vadd.f32 %v588_v8, %v3346_v45  ;;  %2564 = vmatpush3.bf16.msra.mxu0 %v2971_v55  ;;  %v661_v14 = vmax.f32 %v474_v2, 0.0  ;;  %v663_v17 = vmax.f32 %v587_v3, 0.0  ;;  %2628 = vmatpush3.bf16.msra.mxu1 %v2973_v62  ;;  %v2983_v62 = vld [vmem:[#allocation2 + $0x38] ss:$12 sps:$4 sm:$0xff]  }
 0x106   : > { %v479_v18 = vpop.f32.mrf.mxu0  ;;  %v592_v19 = vpop.f32.mrf.mxu1  ;;  %2565 = vmatprep.subr.bf16.mxu0 %v2974_v63  ;;  %2629 = vmatprep.subr.bf16.mxu1 %v2976_v4  ;;  %v2985_v4 = vld [vmem:[#allocation2 + $0x1b8] ss:$12 sps:$4 sm:$0xff]  }
 0x107   : > { %v662_v24 = vmax.f32 %v476_v9, 0.0  ;;  %v664_v25 = vmax.f32 %v589_v10, 0.0  ;;  %v3408_v33 = vpack.c.bf16 %v661_v14, %v657_v26  ;;  %v3410_v34 = vpack.c.bf16 %v663_v17, %v659_v0  ;;  %v2989_v0 = vld [vmem:[#allocation2 + $0x1a0] ss:$12 sps:$4 sm:$0xff]  }
 0x108   : > { %v481_v27 = vpop.f32.mrf.mxu0  ;;  %v594_v28 = vpop.f32.mrf.mxu1  ;;  %v480_v52 = vadd.f32 %v479_v18, %v3350_v46  ;;  %v593_v55 = vadd.f32 %v592_v19, %v3354_v47 }
 0x109   : > { %v3404_v29 = vpack.c.bf16 %v664_v25, %v660_v23  ;;  %v3406_v30 = vpack.c.bf16 %v662_v24, %v658_v22  ;;  %2566 = vmatpush3.bf16.msra.mxu0 %v2975_v13  ;;  %v482_v35 = vadd.f32 %v481_v27, %v3344_v44  ;;  %2630 = vmatpush3.bf16.msra.mxu1 %v2977_v20  ;;  %v2987_v20 = vld [vmem:[#allocation2 + $0x20] ss:$12 sps:$4 sm:$0xff]   ;;  %v2990_v27 = vld [vmem:[#allocation2 + $0xc8] ss:$12 sps:$4 sm:$0xff]  }
 0x10a   : > { %v483_v38 = vpop.f32.mrf.mxu0  ;;  %v596_v41 = vpop.f32.mrf.mxu1  ;;  %2567 = vmatprep.subr.bf16.mxu0 %v2978_v21  ;;  %v595_v48 = vadd.f32 %v594_v28, %v3346_v45  ;;  %2631 = vmatprep.subr.bf16.mxu1 %v2980_v32  ;;  %v665_v10 = vmax.f32 %v480_v52, 0.0  ;;  %v667_v13 = vmax.f32 %v593_v55, 0.0  ;;  %v2988_v21 = vld [vmem:[#allocation2 + $0x260] ss:$12 sps:$4 sm:$0xff]  }
 0x10b   : > { %v484_v49 = vadd.f32 %v483_v38, %v3350_v46  ;;  %v597_v50 = vadd.f32 %v596_v41, %v3354_v47  ;;  %1446 = vmatprep.mubr.bf16.mxu0 %v3406_v30  ;;  %1559 = vmatprep.mubr.bf16.mxu1 %v3404_v29  ;;  %v666_v6 = vmax.f32 %v482_v35, 0.0  ;;  %v2992_v35 = vld [vmem:[#allocation2 + $0x248] ss:$12 sps:$4 sm:$0xff]  }
 0x10c   : > { %v485_v56 = vpop.f32.mrf.mxu0  ;;  %v598_v59 = vpop.f32.mrf.mxu1  ;;  %1447 = vmatmul.mubr.bf16.gmra.mxu0 %v3408_v33  ;;  %1560 = vmatmul.mubr.bf16.gmra.mxu1 %v3410_v34  ;;  %v668_v7 = vmax.f32 %v595_v48, 0.0 }
 0x10d   : > { %v486_v60 = vadd.f32 %v485_v56, %v3344_v44  ;;  %v599_v61 = vadd.f32 %v598_v59, %v3346_v45  ;;  %2568 = vmatpush3.bf16.msra.mxu0 %v2979_v31  ;;  %v669_v63 = vmax.f32 %v484_v49, 0.0  ;;  %v671_v1 = vmax.f32 %v597_v50, 0.0  ;;  %2632 = vmatpush3.bf16.msra.mxu1 %v2981_v42  ;;  %v2991_v50 = vld [vmem:[#allocation2 + $0x8] ss:$12 sps:$4 sm:$0xff]  }
 0x10e   : > { %v489_v2 = vpop.f32.mrf.mxu0  ;;  %v602_v3 = vpop.f32.mrf.mxu1  ;;  %2569 = vmatprep.subr.bf16.mxu0 %v2982_v43  ;;  %2633 = vmatprep.subr.bf16.mxu1 %v2984_v51  ;;  %v2993_v59 = vld [vmem:[#allocation2 + $0x188] ss:$12 sps:$4 sm:$0xff]  }
 0x10f   : > { %v670_v8 = vmax.f32 %v486_v60, 0.0  ;;  %v672_v9 = vmax.f32 %v599_v61, 0.0  ;;  %v3428_v22 = vpack.c.bf16 %v669_v63, %v665_v10  ;;  %v3430_v23 = vpack.c.bf16 %v671_v1, %v667_v13  ;;  %v2994_v60 = vld [vmem:[%s3798_s5 + $0x78] sm:$0xff]  }
 0x110   : > { %v491_v14 = vpop.f32.mrf.mxu0  ;;  %v604_v17 = vpop.f32.mrf.mxu1  ;;  %v490_v38 = vadd.f32 %v489_v2, %v3350_v46  ;;  %v603_v41 = vadd.f32 %v602_v3, %v3354_v47 }
 0x111   : > { %v3424_v18 = vpack.c.bf16 %v672_v9, %v668_v7  ;;  %v3426_v19 = vpack.c.bf16 %v670_v8, %v666_v6  ;;  %2570 = vmatpush3.bf16.msra.mxu0 %v2983_v62  ;;  %v492_v24 = vadd.f32 %v491_v14, %v3344_v44  ;;  %2634 = vmatpush3.bf16.msra.mxu1 %v2985_v4 }
 0x112   : > { %v493_v25 = vpop.f32.mrf.mxu0  ;;  %v606_v26 = vpop.f32.mrf.mxu1  ;;  %2571 = vmatprep.subr.bf16.mxu0 %v2986_v5  ;;  %v605_v28 = vadd.f32 %v604_v17, %v3346_v45  ;;  %2635 = vmatprep.subr.bf16.mxu1 %v2988_v21  ;;  %v673_v2 = vmax.f32 %v490_v38, 0.0  ;;  %v675_v3 = vmax.f32 %v603_v41, 0.0 }
 0x113   : > { %v494_v31 = vadd.f32 %v493_v25, %v3350_v46  ;;  %v607_v32 = vadd.f32 %v606_v26, %v3354_v47  ;;  %1456 = vmatprep.mubr.bf16.mxu0 %v3426_v19  ;;  %1569 = vmatprep.mubr.bf16.mxu1 %v3424_v18  ;;  %v674_v61 = vmax.f32 %v492_v24, 0.0 }
 0x114   : > { %v495_v42 = vpop.f32.mrf.mxu0  ;;  %v608_v43 = vpop.f32.mrf.mxu1  ;;  %1457 = vmatmul.mubr.bf16.gmra.mxu0 %v3428_v22  ;;  %1570 = vmatmul.mubr.bf16.gmra.mxu1 %v3430_v23  ;;  %v676_v62 = vmax.f32 %v605_v28, 0.0 }
 0x115   : > { %v496_v48 = vadd.f32 %v495_v42, %v3344_v44  ;;  %v609_v49 = vadd.f32 %v608_v43, %v3346_v45  ;;  %2572 = vmatpush3.bf16.msra.mxu0 %v2987_v20  ;;  %v677_v51 = vmax.f32 %v494_v31, 0.0  ;;  %v679_v52 = vmax.f32 %v607_v32, 0.0  ;;  %2636 = vmatpush3.bf16.msra.mxu1 %v2989_v0 }
 0x116   : > { %v499_v55 = vpop.f32.mrf.mxu0  ;;  %v612_v56 = vpop.f32.mrf.mxu1  ;;  %2573 = vmatprep.subr.bf16.mxu0 %v2990_v27  ;;  %2637 = vmatprep.subr.bf16.mxu1 %v2992_v35 }
 0x117   : > { %v678_v63 = vmax.f32 %v496_v48, 0.0  ;;  %v680_v1 = vmax.f32 %v609_v49, 0.0  ;;  %v3451_v8 = vpack.c.bf16 %v677_v51, %v673_v2  ;;  %v3453_v9 = vpack.c.bf16 %v679_v52, %v675_v3 }
 0x118   : > { %v501_v4 = vpop.f32.mrf.mxu0  ;;  %v614_v5 = vpop.f32.mrf.mxu1  ;;  %v500_v24 = vadd.f32 %v499_v55, %v3350_v46  ;;  %v613_v25 = vadd.f32 %v612_v56, %v3354_v47 }
 0x119   : > { %v3447_v6 = vpack.c.bf16 %v678_v63, %v674_v61  ;;  %v3449_v7 = vpack.c.bf16 %v680_v1, %v676_v62  ;;  %2574 = vmatpush3.bf16.msra.mxu0 %v2991_v50  ;;  %v502_v10 = vadd.f32 %v501_v4, %v3344_v44  ;;  %2638 = vmatpush3.bf16.msra.mxu1 %v2993_v59 }
 0x11a   : > { %v503_v13 = vpop.f32.mrf.mxu0  ;;  %v616_v14 = vpop.f32.mrf.mxu1  ;;  %2687 = vmatprep.subr.bf16.mxu0 %v2994_v60  ;;  %v615_v17 = vadd.f32 %v614_v5, %v3346_v45  ;;  %v681_v49 = vmax.f32 %v500_v24, 0.0  ;;  %v683_v50 = vmax.f32 %v613_v25, 0.0 }
 0x11b   : > { %v504_v20 = vadd.f32 %v503_v13, %v3350_v46  ;;  %v617_v21 = vadd.f32 %v616_v14, %v3354_v47  ;;  %1466 = vmatprep.mubr.bf16.mxu0 %v3447_v6  ;;  %1579 = vmatprep.mubr.bf16.mxu1 %v3449_v7  ;;  %v682_v41 = vmax.f32 %v502_v10, 0.0 }
 0x11c   : > { %v505_v26 = vpop.f32.mrf.mxu0  ;;  %v618_v0 = vpop.f32.mrf.mxu1  ;;  %1467 = vmatmul.mubr.bf16.gmra.mxu0 %v3451_v8  ;;  %1580 = vmatmul.mubr.bf16.gmra.mxu1 %v3453_v9  ;;  %v684_v42 = vmax.f32 %v615_v17, 0.0 }
 0x11d   : > { %v506_v27 = vadd.f32 %v505_v26, %v3344_v44  ;;  %v619_v28 = vadd.f32 %v618_v0, %v3346_v45  ;;  %v685_v31 = vmax.f32 %v504_v20, 0.0  ;;  %v687_v32 = vmax.f32 %v617_v21, 0.0 }
 0x11e   : > { %v509_v35 = vpop.f32.mrf.mxu0  ;;  %v622_v38 = vpop.f32.mrf.mxu1 }
 0x11f   : > { %v686_v43 = vmax.f32 %v506_v27, 0.0  ;;  %v688_v48 = vmax.f32 %v619_v28, 0.0  ;;  %v3471_v59 = vpack.c.bf16 %v685_v31, %v681_v49  ;;  %v3473_v60 = vpack.c.bf16 %v687_v32, %v683_v50 }
 0x120   : > { %v511_v51 = vpop.f32.mrf.mxu0  ;;  %v624_v52 = vpop.f32.mrf.mxu1  ;;  %v510_v4 = vadd.f32 %v509_v35, %v3350_v46  ;;  %v623_v5 = vadd.f32 %v622_v38, %v3354_v47 }
 0x121   : > { %v3467_v55 = vpack.c.bf16 %v686_v43, %v682_v41  ;;  %v3469_v56 = vpack.c.bf16 %v688_v48, %v684_v42  ;;  %v512_v61 = vadd.f32 %v511_v51, %v3344_v44  ;;  %v625_v1 = vadd.f32 %v624_v52, %v3346_v45 }
 0x122   : > { %v513_v62 = vpop.f32.mrf.mxu0  ;;  %v626_v63 = vpop.f32.mrf.mxu1  ;;  %v689_v31 = vmax.f32 %v510_v4, 0.0  ;;  %v691_v32 = vmax.f32 %v623_v5, 0.0 }
 0x123   : > { %v514_v2 = vadd.f32 %v513_v62, %v3350_v46  ;;  %v627_v3 = vadd.f32 %v626_v63, %v3354_v47  ;;  %1476 = vmatprep.mubr.bf16.mxu0 %v3467_v55  ;;  %1589 = vmatprep.mubr.bf16.mxu1 %v3469_v56  ;;  %v690_v26 = vmax.f32 %v512_v61, 0.0  ;;  %v692_v0 = vmax.f32 %v625_v1, 0.0 }
 0x124   : > { %v515_v10 = vpop.f32.mrf.mxu0  ;;  %v628_v13 = vpop.f32.mrf.mxu1  ;;  %1477 = vmatmul.mubr.bf16.gmra.mxu0 %v3471_v59  ;;  %1590 = vmatmul.mubr.bf16.gmra.mxu1 %v3473_v60 }
 0x125   : > { %v516_v14 = vadd.f32 %v515_v10, %v3344_v44  ;;  %v629_v17 = vadd.f32 %v628_v13, %v3346_v45  ;;  %v693_v20 = vmax.f32 %v514_v2, 0.0  ;;  %v695_v21 = vmax.f32 %v627_v3, 0.0 }
 0x126   : > { %v519_v24 = vpop.f32.mrf.mxu0  ;;  %v632_v25 = vpop.f32.mrf.mxu1 }
 0x127   : > { %v694_v27 = vmax.f32 %v516_v14, 0.0  ;;  %v696_v28 = vmax.f32 %v629_v17, 0.0  ;;  %v3491_v43 = vpack.c.bf16 %v693_v20, %v689_v31  ;;  %v3493_v48 = vpack.c.bf16 %v695_v21, %v691_v32 }
 0x128   : > { %v521_v35 = vpop.f32.mrf.mxu0  ;;  %v634_v38 = vpop.f32.mrf.mxu1  ;;  %v520_v63 = vadd.f32 %v519_v24, %v3350_v46  ;;  %v633_v1 = vadd.f32 %v632_v25, %v3354_v47 }
 0x129   : > { %v3487_v41 = vpack.c.bf16 %v694_v27, %v690_v26  ;;  %v3489_v42 = vpack.c.bf16 %v696_v28, %v692_v0  ;;  %v522_v49 = vadd.f32 %v521_v35, %v3344_v44  ;;  %v635_v52 = vadd.f32 %v634_v38, %v3346_v45 }
 0x12a   : > { %v523_v50 = vpop.f32.mrf.mxu0  ;;  %v636_v51 = vpop.f32.mrf.mxu1  ;;  %v697_v26 = vmax.f32 %v520_v63, 0.0 }
 0x12b   : > { %v524_v61 = vadd.f32 %v523_v50, %v3350_v46  ;;  %v637_v62 = vadd.f32 %v636_v51, %v3354_v47  ;;  %1486 = vmatprep.mubr.bf16.mxu0 %v3487_v41  ;;  %1599 = vmatprep.mubr.bf16.mxu1 %v3489_v42  ;;  %v698_v14 = vmax.f32 %v522_v49, 0.0  ;;  %v700_v17 = vmax.f32 %v635_v52, 0.0 }
 0x12c   : > { %v525_v2 = vpop.f32.mrf.mxu0  ;;  %v638_v3 = vpop.f32.mrf.mxu1  ;;  %1487 = vmatmul.mubr.bf16.gmra.mxu0 %v3491_v43  ;;  %1600 = vmatmul.mubr.bf16.gmra.mxu1 %v3493_v48  ;;  %v699_v46 = vmax.f32 %v633_v1, 0.0 }
 0x12d   : > { %v526_v4 = vadd.f32 %v525_v2, %v3344_v44  ;;  %v639_v5 = vadd.f32 %v638_v3, %v3346_v45  ;;  %v701_v10 = vmax.f32 %v524_v61, 0.0  ;;  %v703_v13 = vmax.f32 %v637_v62, 0.0  ;;  %v2995_v44 = vld [vmem:[%s3798_s5 + $0x38] sm:$0xff]   ;;  %v2996_v45 = vld [vmem:[%s3798_s5 + $0x70] sm:$0xff]  }
 0x12f   : > { %v702_v20 = vmax.f32 %v526_v4, 0.0  ;;  %v704_v21 = vmax.f32 %v639_v5, 0.0  ;;  %v3511_v25 = vpack.c.bf16 %v701_v10, %v697_v26  ;;  %v3513_v0 = vpack.c.bf16 %v703_v13, %v699_v46 }
 0x131   : > { %v3507_v24 = vpack.c.bf16 %v702_v20, %v698_v14  ;;  %v3509_v47 = vpack.c.bf16 %v704_v21, %v700_v17 }
 0x133   : > { %1496 = vmatprep.mubr.bf16.mxu0 %v3507_v24  ;;  %1609 = vmatprep.mubr.bf16.mxu1 %v3509_v47 }
 0x134   : > { %1497 = vmatmul.mubr.bf16.gmra.mxu0 %v3511_v25  ;;  %1610 = vmatmul.mubr.bf16.gmra.mxu1 %v3513_v0 }
 0x135   : > { %1652 = vmatprep.mubr.bf16.mxu0 %v3366_v12  ;;  %1749 = vmatprep.mubr.bf16.mxu1 %v3364_v11  ;;  %v2997_v11 = vld [vmem:[%s3798_s5 + $0x30] sm:$0xff]   ;;  %v2998_v12 = vld [vmem:[%s3798_s5 + $0x68] sm:$0xff]  }
 0x13c   : > { %1653 = vmatmul.mubr.bf16.vlgmr.msra.gmra.mxu0 %v3368_v15  ;;  %1750 = vmatmul.mubr.bf16.vlgmr.msra.gmra.mxu1 %v3370_v16  ;;  %v2999_v15 = vld [vmem:[%s3798_s5 + $0x28] sm:$0xff]   ;;  %v3000_v16 = vld [vmem:[%s3798_s5 + $0x60] sm:$0xff]  }
 0x13d   : > { %1660 = vmatprep.mubr.bf16.mxu0 %v3386_v54  ;;  %1757 = vmatprep.mubr.bf16.mxu1 %v3384_v53  ;;  %v3001_v53 = vld [vmem:[%s3798_s5 + $0x20] sm:$0xff]   ;;  %v3002_v54 = vld [vmem:[%s3798_s5 + $0x58] sm:$0xff]  }
 0x13e   : > { %2688 = vmatpush3.bf16.msra.mxu0 %v2995_v44 }
 0x13f   : > { %2689 = vmatprep.subr.bf16.mxu0 %v2996_v45 }
 0x142   : > { %2690 = vmatpush3.bf16.msra.mxu0 %v2997_v11 }
 0x143   : > { %2691 = vmatprep.subr.bf16.mxu0 %v2998_v12 }
 0x144   : > { %1661 = vmatmul.mubr.bf16.gmra.mxu0 %v3388_v57  ;;  %1758 = vmatmul.mubr.bf16.gmra.mxu1 %v3390_v58  ;;  %v3003_v57 = vld [vmem:[%s3798_s5 + $0x18] sm:$0xff]   ;;  %v3004_v58 = vld [vmem:[%s3798_s5 + $0x50] sm:$0xff]  }
 0x145   : > { %1668 = vmatprep.mubr.bf16.mxu0 %v3406_v30  ;;  %1765 = vmatprep.mubr.bf16.mxu1 %v3404_v29  ;;  %v3005_v29 = vld [vmem:[%s3798_s5 + $0x10] sm:$0xff]   ;;  %v3006_v30 = vld [vmem:[%s3798_s5 + $0x48] sm:$0xff]  }
 0x146   : > { %2692 = vmatpush3.bf16.msra.mxu0 %v2999_v15 }
 0x147   : > { %2693 = vmatprep.subr.bf16.mxu0 %v3000_v16 }
 0x14a   : > { %2694 = vmatpush3.bf16.msra.mxu0 %v3001_v53 }
 0x14b   : > { %2695 = vmatprep.subr.bf16.mxu0 %v3002_v54 }
 0x14c   : > { %1669 = vmatmul.mubr.bf16.gmra.mxu0 %v3408_v33  ;;  %1766 = vmatmul.mubr.bf16.gmra.mxu1 %v3410_v34  ;;  %v3007_v33 = vld [vmem:[%s3798_s5 + $0x8] sm:$0xff]   ;;  %v3008_v34 = vld [vmem:[%s3798_s5 + $0x40] sm:$0xff]  }
 0x14d   : > { %1676 = vmatprep.mubr.bf16.mxu0 %v3426_v19  ;;  %1773 = vmatprep.mubr.bf16.mxu1 %v3424_v18  ;;  %v3009_v18 = vld [vmem:[%s3798_s5] sm:$0xff]   ;;  %v3010_v19 = vld [vmem:[%s3798_s5 + $0xb8] sm:$0xff]  }
 0x14e   : > { %2696 = vmatpush3.bf16.msra.mxu0 %v3003_v57  ;;  %2767 = vmatprep.subr.bf16.mxu1 %v3010_v19 }
 0x14f   : > { %2697 = vmatprep.subr.bf16.mxu0 %v3004_v58  ;;  %2768 = vmatpush3.bf16.msra.mxu1 %v3010_v19 }
 0x152   : > { %2698 = vmatpush3.bf16.msra.mxu0 %v3005_v29 }
 0x153   : > { %2699 = vmatprep.subr.bf16.mxu0 %v3006_v30 }
 0x154   : > { %1677 = vmatmul.mubr.bf16.gmra.mxu0 %v3428_v22  ;;  %1774 = vmatmul.mubr.bf16.gmra.mxu1 %v3430_v23  ;;  %v3011_v22 = vld [vmem:[%s3798_s5 + $0xb0] sm:$0xff]   ;;  %v3012_v23 = vld [vmem:[%s3798_s5 + $0xa8] sm:$0xff]  }
 0x155   : > { %1684 = vmatprep.mubr.bf16.mxu0 %v3447_v6  ;;  %1781 = vmatprep.mubr.bf16.mxu1 %v3449_v7  ;;  %v3013_v6 = vld [vmem:[%s3798_s5 + $0xa0] sm:$0xff]   ;;  %v3014_v7 = vld [vmem:[%s3798_s5 + $0x98] sm:$0xff]  }
 0x156   : > { %2700 = vmatpush3.bf16.msra.mxu0 %v3007_v33  ;;  %2769 = vmatprep.subr.bf16.mxu1 %v3011_v22 }
 0x157   : > { %2701 = vmatprep.subr.bf16.mxu0 %v3008_v34  ;;  %2770 = vmatpush3.bf16.msra.mxu1 %v3011_v22 }
 0x158   : > { %2771 = vmatprep.subr.bf16.mxu1 %v3012_v23 }
 0x15a   : > { %2702 = vmatpush3.bf16.msra.mxu0 %v3009_v18 }
 0x15b   : > { %2772 = vmatpush3.bf16.msra.mxu1 %v3012_v23 }
 0x15c   : > { %1685 = vmatmul.mubr.bf16.gmra.mxu0 %v3451_v8  ;;  %1782 = vmatmul.mubr.bf16.gmra.mxu1 %v3453_v9  ;;  %v3015_v8 = vld [vmem:[%s3798_s5 + $0x90] sm:$0xff]   ;;  %v3016_v9 = vld [vmem:[%s3798_s5 + $0x88] sm:$0xff]  }
 0x15d   : > { %1692 = vmatprep.mubr.bf16.mxu0 %v3467_v55  ;;  %1789 = vmatprep.mubr.bf16.mxu1 %v3469_v56  ;;  %v3017_v55 = vld [vmem:[%s3798_s5 + $0x80] sm:$0xff]  }
 0x15e   : > { %2773 = vmatprep.subr.bf16.mxu1 %v3013_v6  ;;  %v3623_v56 = vld [vmem:[%s3797_s4] sm:$0x7] }
 0x15f   : > { %2774 = vmatpush3.bf16.msra.mxu1 %v3013_v6 }
 0x160   : > { %2775 = vmatprep.subr.bf16.mxu1 %v3014_v7 }
 0x163   : > { %2776 = vmatpush3.bf16.msra.mxu1 %v3014_v7 }
 0x164   : > { %1693 = vmatmul.mubr.bf16.gmra.mxu0 %v3471_v59  ;;  %1790 = vmatmul.mubr.bf16.gmra.mxu1 %v3473_v60  ;;  %v3628_v59 = vrot.slane %v3623_v56, %v336_v37  ;;  %v3633_v60 = vrot.slane %v3623_v56, %v332_v39 }
 0x165   : > { %1700 = vmatprep.mubr.bf16.mxu0 %v3487_v41  ;;  %1797 = vmatprep.mubr.bf16.mxu1 %v3489_v42 }
 0x166   : > { %2777 = vmatprep.subr.bf16.mxu1 %v3015_v8 }
 0x167   : > { %2778 = vmatpush3.bf16.msra.mxu1 %v3015_v8 }
 0x168   : > { %2779 = vmatprep.subr.bf16.mxu1 %v3016_v9 }
 0x16b   : > { %2780 = vmatpush3.bf16.msra.mxu1 %v3016_v9 }
 0x16c   : > { %1701 = vmatmul.mubr.bf16.gmra.mxu0 %v3491_v43  ;;  %1798 = vmatmul.mubr.bf16.gmra.mxu1 %v3493_v48 }
 0x16d   : > { %1708 = vmatprep.mubr.bf16.mxu0 %v3507_v24  ;;  %1805 = vmatprep.mubr.bf16.mxu1 %v3509_v47 }
 0x16e   : > { %2781 = vmatprep.subr.bf16.mxu1 %v3017_v55 }
 0x16f   : > { %2782 = vmatpush3.bf16.msra.mxu1 %v3017_v55 }
 0x174   : > { %1709 = vmatmul.mubr.bf16.gmra.mxu0 %v3511_v25  ;;  %1806 = vmatmul.mubr.bf16.gmra.mxu1 %v3513_v0 }
 0x1bc   : > { %v1428_v27 = vpop.f32.mrf.mxu0  ;;  %v1541_v28 = vpop.f32.mrf.mxu1 }
 0x1bd   : > { %v1429_v38 = vadd.f32 %v1428_v27, %v3633_v60 }
 0x1be   : > { %v1430_v31 = vpop.f32.mrf.mxu0  ;;  %v1543_v32 = vpop.f32.mrf.mxu1 }
 0x1bf   : > { %v1431_v35 = vadd.f32 %v1430_v31, %v3628_v59  ;;  %v1542_v39 = vadd.f32 %v1541_v28, %v1429_v38 }
 0x1c0   : > { %v1432_v41 = vpop.f32.mrf.mxu0  ;;  %v1545_v42 = vpop.f32.mrf.mxu1 }
 0x1c1   : > { %v1433_v43 = vadd.f32 %v1432_v41, %v3633_v60  ;;  %v1544_v49 = vadd.f32 %v1543_v32, %v1431_v35  ;;  %v1814_v10 = vmax.f32 %v1542_v39, 0.0 }
 0x1c2   : > { %v1434_v48 = vpop.f32.mrf.mxu0  ;;  %v1547_v37 = vpop.f32.mrf.mxu1 }
 0x1c3   : > { %v1546_v50 = vadd.f32 %v1545_v42, %v1433_v43  ;;  %v1435_v51 = vadd.f32 %v1434_v48, %v3628_v59  ;;  %v1815_v3 = vmax.f32 %v1544_v49, 0.0 }
 0x1c4   : > { %v1438_v52 = vpop.f32.mrf.mxu0  ;;  %v1551_v61 = vpop.f32.mrf.mxu1 }
 0x1c5   : > { %v1548_v62 = vadd.f32 %v1547_v37, %v1435_v51  ;;  %v1817_v63 = vmax.f32 %v1546_v50, 0.0  ;;  %v1439_v13 = vadd.f32 %v1438_v52, %v3633_v60 }
 0x1c6   : > { %v1440_v1 = vpop.f32.mrf.mxu0  ;;  %v1553_v2 = vpop.f32.mrf.mxu1 }
 0x1c7   : > { %v1818_v4 = vmax.f32 %v1548_v62, 0.0  ;;  %v1441_v5 = vadd.f32 %v1440_v1, %v3628_v59  ;;  %v1862_v26 = vpack.c.bf16 %v1817_v63, %v1814_v10  ;;  %v1552_v44 = vadd.f32 %v1551_v61, %v1439_v13 }
 0x1c8   : > { %v1442_v14 = vpop.f32.mrf.mxu0  ;;  %v1555_v17 = vpop.f32.mrf.mxu1 }
 0x1c9   : > { %v1863_v20 = vpack.c.bf16 %v1818_v4, %v1815_v3  ;;  %v1443_v21 = vadd.f32 %v1442_v14, %v3633_v60  ;;  %v1554_v47 = vadd.f32 %v1553_v2, %v1441_v5  ;;  %v1820_v29 = vmax.f32 %v1552_v44, 0.0 }
 0x1ca   : > { %v1444_v46 = vpop.f32.mrf.mxu0  ;;  %v1557_v24 = vpop.f32.mrf.mxu1 }
 0x1cb   : > { %v1556_v25 = vadd.f32 %v1555_v17, %v1443_v21  ;;  %v1445_v0 = vadd.f32 %v1444_v46, %v3628_v59  ;;  %2117 = vmatprep.mubr.bf16.mxu0 %v1863_v20  ;;  %v1821_v54 = vmax.f32 %v1554_v47, 0.0 }
 0x1cc   : > { %v1448_v45 = vpop.f32.mrf.mxu0  ;;  %v1561_v11 = vpop.f32.mrf.mxu1  ;;  %2118 = vmatmul.mubr.bf16.vlgmr.msra.gmra.mxu0 %v1862_v26 }
 0x1cd   : > { %v1558_v12 = vadd.f32 %v1557_v24, %v1445_v0  ;;  %v1823_v15 = vmax.f32 %v1556_v25, 0.0  ;;  %v1449_v30 = vadd.f32 %v1448_v45, %v3633_v60 }
 0x1ce   : > { %v1450_v16 = vpop.f32.mrf.mxu0  ;;  %v1563_v53 = vpop.f32.mrf.mxu1 }
 0x1cf   : > { %v1824_v57 = vmax.f32 %v1558_v12, 0.0  ;;  %v1451_v58 = vadd.f32 %v1450_v16, %v3628_v59  ;;  %v1865_v22 = vpack.c.bf16 %v1823_v15, %v1820_v29  ;;  %v1562_v55 = vadd.f32 %v1561_v11, %v1449_v30 }
 0x1d0   : > { %v1452_v33 = vpop.f32.mrf.mxu0  ;;  %v1565_v34 = vpop.f32.mrf.mxu1 }
 0x1d1   : > { %v1866_v18 = vpack.c.bf16 %v1824_v57, %v1821_v54  ;;  %v1453_v19 = vadd.f32 %v1452_v33, %v3633_v60  ;;  %v1564_v7 = vadd.f32 %v1563_v53, %v1451_v58  ;;  %v1826_v48 = vmax.f32 %v1562_v55, 0.0 }
 0x1d2   : > { %v1454_v23 = vpop.f32.mrf.mxu0  ;;  %v1567_v6 = vpop.f32.mrf.mxu1 }
 0x1d3   : > { %v1566_v8 = vadd.f32 %v1565_v34, %v1453_v19  ;;  %v1455_v9 = vadd.f32 %v1454_v23, %v3628_v59  ;;  %2125 = vmatprep.mubr.bf16.mxu0 %v1866_v18  ;;  %v1827_v41 = vmax.f32 %v1564_v7, 0.0 }
 0x1d4   : > { %v1458_v27 = vpop.f32.mrf.mxu0  ;;  %v1571_v28 = vpop.f32.mrf.mxu1  ;;  %2126 = vmatmul.mubr.bf16.gmra.mxu0 %v1865_v22 }
 0x1d5   : > { %v1568_v31 = vadd.f32 %v1567_v6, %v1455_v9  ;;  %v1829_v32 = vmax.f32 %v1566_v8, 0.0  ;;  %v1459_v37 = vadd.f32 %v1458_v27, %v3633_v60 }
 0x1d6   : > { %v1460_v35 = vpop.f32.mrf.mxu0  ;;  %v1573_v38 = vpop.f32.mrf.mxu1 }
 0x1d7   : > { %v1830_v42 = vmax.f32 %v1568_v31, 0.0  ;;  %v1461_v43 = vadd.f32 %v1460_v35, %v3628_v59  ;;  %v1868_v52 = vpack.c.bf16 %v1829_v32, %v1826_v48  ;;  %v1572_v3 = vadd.f32 %v1571_v28, %v1459_v37 }
 0x1d8   : > { %v1462_v49 = vpop.f32.mrf.mxu0  ;;  %v1575_v50 = vpop.f32.mrf.mxu1 }
 0x1d9   : > { %v1869_v51 = vpack.c.bf16 %v1830_v42, %v1827_v41  ;;  %v1463_v39 = vadd.f32 %v1462_v49, %v3633_v60  ;;  %v1574_v63 = vadd.f32 %v1573_v38, %v1461_v43  ;;  %v1832_v46 = vmax.f32 %v1572_v3, 0.0 }
 0x1da   : > { %v1464_v61 = vpop.f32.mrf.mxu0  ;;  %v1577_v62 = vpop.f32.mrf.mxu1 }
 0x1db   : > { %v1576_v1 = vadd.f32 %v1575_v50, %v1463_v39  ;;  %v1465_v2 = vadd.f32 %v1464_v61, %v3628_v59  ;;  %2133 = vmatprep.mubr.bf16.mxu0 %v1869_v51  ;;  %v1833_v20 = vmax.f32 %v1574_v63, 0.0 }
 0x1dc   : > { %v1468_v4 = vpop.f32.mrf.mxu0  ;;  %v1581_v5 = vpop.f32.mrf.mxu1  ;;  %2134 = vmatmul.mubr.bf16.gmra.mxu0 %v1868_v52 }
 0x1dd   : > { %v1578_v10 = vadd.f32 %v1577_v62, %v1465_v2  ;;  %v1835_v13 = vmax.f32 %v1576_v1, 0.0  ;;  %v1469_v24 = vadd.f32 %v1468_v4, %v3633_v60 }
 0x1de   : > { %v1470_v14 = vpop.f32.mrf.mxu0  ;;  %v1583_v17 = vpop.f32.mrf.mxu1 }
 0x1df   : > { %v1836_v21 = vmax.f32 %v1578_v10, 0.0  ;;  %v1471_v26 = vadd.f32 %v1470_v14, %v3628_v59  ;;  %v1871_v45 = vpack.c.bf16 %v1835_v13, %v1832_v46  ;;  %v1582_v54 = vadd.f32 %v1581_v5, %v1469_v24 }
 0x1e0   : > { %v1472_v47 = vpop.f32.mrf.mxu0  ;;  %v1585_v25 = vpop.f32.mrf.mxu1 }
 0x1e1   : > { %v1872_v0 = vpack.c.bf16 %v1836_v21, %v1833_v20  ;;  %v1473_v44 = vadd.f32 %v1472_v47, %v3633_v60  ;;  %v1584_v15 = vadd.f32 %v1583_v17, %v1471_v26  ;;  %v1838_v23 = vmax.f32 %v1582_v54, 0.0 }
 0x1e2   : > { %v1474_v11 = vpop.f32.mrf.mxu0  ;;  %v1587_v12 = vpop.f32.mrf.mxu1 }
 0x1e3   : > { %v1586_v16 = vadd.f32 %v1585_v25, %v1473_v44  ;;  %v1475_v53 = vadd.f32 %v1474_v11, %v3628_v59  ;;  %2141 = vmatprep.mubr.bf16.mxu0 %v1872_v0  ;;  %v1839_v18 = vmax.f32 %v1584_v15, 0.0 }
 0x1e4   : > { %v1478_v57 = vpop.f32.mrf.mxu0  ;;  %v1591_v58 = vpop.f32.mrf.mxu1  ;;  %2142 = vmatmul.mubr.bf16.gmra.mxu0 %v1871_v45 }
 0x1e5   : > { %v1588_v29 = vadd.f32 %v1587_v12, %v1475_v53  ;;  %v1841_v30 = vmax.f32 %v1586_v16, 0.0  ;;  %v1479_v6 = vadd.f32 %v1478_v57, %v3633_v60 }
 0x1e6   : > { %v1480_v33 = vpop.f32.mrf.mxu0  ;;  %v1593_v34 = vpop.f32.mrf.mxu1 }
 0x1e7   : > { %v1842_v19 = vmax.f32 %v1588_v29, 0.0  ;;  %v1481_v22 = vadd.f32 %v1480_v33, %v3628_v59  ;;  %v1874_v27 = vpack.c.bf16 %v1841_v30, %v1838_v23  ;;  %v1592_v41 = vadd.f32 %v1591_v58, %v1479_v6 }
 0x1e8   : > { %v1482_v7 = vpop.f32.mrf.mxu0  ;;  %v1595_v8 = vpop.f32.mrf.mxu1  ;;  %v3670_v6 = vrot.slane %v3623_v56, %v340_v40 }
 0x1e9   : > { %v1875_v9 = vpack.c.bf16 %v1842_v19, %v1839_v18  ;;  %v1483_v55 = vadd.f32 %v1482_v7, %v3633_v60  ;;  %v1594_v32 = vadd.f32 %v1593_v34, %v1481_v22  ;;  %v1844_v61 = vmax.f32 %v1592_v41, 0.0 }
 0x1ea   : > { %v1484_v28 = vpop.f32.mrf.mxu0  ;;  %v1597_v31 = vpop.f32.mrf.mxu1 }
 0x1eb   : > { %v1596_v35 = vadd.f32 %v1595_v8, %v1483_v55  ;;  %v1485_v38 = vadd.f32 %v1484_v28, %v3628_v59  ;;  %2149 = vmatprep.mubr.bf16.mxu0 %v1875_v9  ;;  %v1845_v51 = vmax.f32 %v1594_v32, 0.0 }
 0x1ec   : > { %v1488_v42 = vpop.f32.mrf.mxu0  ;;  %v1601_v43 = vpop.f32.mrf.mxu1  ;;  %2150 = vmatmul.mubr.bf16.gmra.mxu0 %v1874_v27 }
 0x1ed   : > { %v1598_v48 = vadd.f32 %v1597_v31, %v1485_v38  ;;  %v1847_v37 = vmax.f32 %v1596_v35, 0.0  ;;  %v1489_v62 = vadd.f32 %v1488_v42, %v3633_v60 }
 0x1ee   : > { %v1490_v49 = vpop.f32.mrf.mxu0  ;;  %v1603_v50 = vpop.f32.mrf.mxu1 }
 0x1ef   : > { %v1848_v39 = vmax.f32 %v1598_v48, 0.0  ;;  %v1491_v52 = vadd.f32 %v1490_v49, %v3628_v59  ;;  %v1877_v4 = vpack.c.bf16 %v1847_v37, %v1844_v61  ;;  %v1602_v20 = vadd.f32 %v1601_v43, %v1489_v62 }
 0x1f0   : > { %v1492_v63 = vpop.f32.mrf.mxu0  ;;  %v1605_v1 = vpop.f32.mrf.mxu1 }
 0x1f1   : > { %v1878_v2 = vpack.c.bf16 %v1848_v39, %v1845_v51  ;;  %v1493_v3 = vadd.f32 %v1492_v63, %v3633_v60  ;;  %v1604_v13 = vadd.f32 %v1603_v50, %v1491_v52  ;;  %v1850_v11 = vmax.f32 %v1602_v20, 0.0 }
 0x1f2   : > { %v1494_v5 = vpop.f32.mrf.mxu0  ;;  %v1607_v10 = vpop.f32.mrf.mxu1 }
 0x1f3   : > { %v1606_v14 = vadd.f32 %v1605_v1, %v1493_v3  ;;  %v1495_v17 = vadd.f32 %v1494_v5, %v3628_v59  ;;  %2157 = vmatprep.mubr.bf16.mxu0 %v1878_v2  ;;  %v1851_v0 = vmax.f32 %v1604_v13, 0.0 }
 0x1f4   : > { %v1498_v21 = vpop.f32.mrf.mxu0  ;;  %v1611_v26 = vpop.f32.mrf.mxu1  ;;  %2158 = vmatmul.mubr.bf16.gmra.mxu0 %v1877_v4 }
 0x1f5   : > { %v1608_v46 = vadd.f32 %v1607_v10, %v1495_v17  ;;  %v1853_v24 = vmax.f32 %v1606_v14, 0.0  ;;  %v1499_v12 = vadd.f32 %v1498_v21, %v3633_v60 }
 0x1f6   : > { %v1500_v47 = vpop.f32.mrf.mxu0  ;;  %v1613_v25 = vpop.f32.mrf.mxu1 }
 0x1f7   : > { %v1854_v44 = vmax.f32 %v1608_v46, 0.0  ;;  %v1501_v45 = vadd.f32 %v1500_v47, %v3628_v59  ;;  %v1880_v57 = vpack.c.bf16 %v1853_v24, %v1850_v11  ;;  %v1612_v18 = vadd.f32 %v1611_v26, %v1499_v12 }
 0x1f8   : > { %v1502_v15 = vpop.f32.mrf.mxu0  ;;  %v1615_v16 = vpop.f32.mrf.mxu1 }
 0x1f9   : > { %v1881_v53 = vpack.c.bf16 %v1854_v44, %v1851_v0  ;;  %v1503_v54 = vadd.f32 %v1502_v15, %v3633_v60  ;;  %v1614_v30 = vadd.f32 %v1613_v25, %v1501_v45  ;;  %v1856_v28 = vmax.f32 %v1612_v18, 0.0 }
 0x1fa   : > { %v1504_v58 = vpop.f32.mrf.mxu0  ;;  %v1617_v29 = vpop.f32.mrf.mxu1 }
 0x1fb   : > { %v1616_v33 = vadd.f32 %v1615_v16, %v1503_v54  ;;  %v1505_v34 = vadd.f32 %v1504_v58, %v3628_v59  ;;  %2165 = vmatprep.mubr.bf16.mxu0 %v1881_v53  ;;  %v1857_v9 = vmax.f32 %v1614_v30, 0.0 }
 0x1fc   : > { %v2575_v19 = vpop.f32.mrf.mxu0  ;;  %v2639_v22 = vpop.f32.mrf.mxu1  ;;  %2166 = vmatmul.mubr.bf16.gmra.mxu0 %v1880_v57 }
 0x1fd   : > { %v1618_v23 = vadd.f32 %v1617_v29, %v1505_v34  ;;  %v1859_v7 = vmax.f32 %v1616_v33, 0.0 }
 0x1fe   : > { %v2576_v60 = vpop.f32.mrf.mxu0  ;;  %v2640_v8 = vpop.f32.mrf.mxu1 }
 0x1ff   : > { %v1860_v55 = vmax.f32 %v1618_v23, 0.0  ;;  %v2577_v27 = vadd.f32 %v2576_v60, %v2575_v19  ;;  %v1883_v38 = vpack.c.bf16 %v1859_v7, %v1856_v28  ;;  %v2641_v43 = vadd.f32 %v2640_v8, %v2639_v22 }
 0x200   : > { %v2578_v31 = vpop.f32.mrf.mxu0  ;;  %v2642_v59 = vpop.f32.mrf.mxu1 }
 0x201   : > { %v1884_v32 = vpack.c.bf16 %v1860_v55, %v1857_v9  ;;  %v1655_v35 = vadd.f32 %v2577_v27, %v3670_v6 }
 0x202   : > { %v2579_v41 = vpop.f32.mrf.mxu0  ;;  %v2643_v42 = vpop.f32.mrf.mxu1 }
 0x203   : > { %v2580_v36 = vadd.f32 %v2579_v41, %v2578_v31  ;;  %2173 = vmatprep.mubr.bf16.mxu0 %v1884_v32  ;;  %v1752_v48 = vadd.f32 %v2641_v43, %v1655_v35  ;;  %v2644_v49 = vadd.f32 %v2643_v42, %v2642_v59 }
 0x204   : > { %v2581_v40 = vpop.f32.mrf.mxu0  ;;  %v2645_v56 = vpop.f32.mrf.mxu1  ;;  %2174 = vmatmul.mubr.bf16.gmra.mxu0 %v1883_v38 }
 0x205   : > { %v1658_v37 = vadd.f32 %v2580_v36, %v3670_v6  ;;  %v1816_v63 = vmax.f32 %v1752_v48, 0.0 }
 0x206   : > { %v2582_v50 = vpop.f32.mrf.mxu0  ;;  %v2646_v51 = vpop.f32.mrf.mxu1 }
 0x207   : > { %v1755_v39 = vadd.f32 %v2644_v49, %v1658_v37  ;;  %v2583_v52 = vadd.f32 %v2582_v50, %v2581_v40  ;;  %v2647_v5 = vadd.f32 %v2646_v51, %v2645_v56 }
 0x208   : > { %v2584_v61 = vpop.f32.mrf.mxu0  ;;  %v2648_v62 = vpop.f32.mrf.mxu1 }
 0x209   : > { %v1819_v1 = vmax.f32 %v1755_v39, 0.0  ;;  %v1663_v2 = vadd.f32 %v2583_v52, %v3670_v6 }
 0x20a   : > { %v2585_v3 = vpop.f32.mrf.mxu0  ;;  %v2649_v4 = vpop.f32.mrf.mxu1 }
 0x20b   : > { %v2586_v10 = vadd.f32 %v2585_v3, %v2584_v61  ;;  %v1864_v13 = vpack.c.bf16 %v1819_v1, %v1816_v63  ;;  %v1760_v20 = vadd.f32 %v2647_v5, %v1663_v2  ;;  %v2650_v26 = vadd.f32 %v2649_v4, %v2648_v62 }
 0x20c   : > { %v2587_v14 = vpop.f32.mrf.mxu0  ;;  %v2651_v17 = vpop.f32.mrf.mxu1 }
 0x20d   : > { %v1666_v21 = vadd.f32 %v2586_v10, %v3670_v6  ;;  %2783 = vmatprep.mubr.bf16.mxu1 %v1864_v13  ;;  %v1822_v45 = vmax.f32 %v1760_v20, 0.0 }
 0x20e   : > { %v2588_v46 = vpop.f32.mrf.mxu0  ;;  %v2652_v24 = vpop.f32.mrf.mxu1 }
 0x20f   : > { %v1763_v47 = vadd.f32 %v2650_v26, %v1666_v21  ;;  %v2589_v25 = vadd.f32 %v2588_v46, %v2587_v14  ;;  %v2653_v54 = vadd.f32 %v2652_v24, %v2651_v17 }
 0x210   : > { %v2590_v0 = vpop.f32.mrf.mxu0  ;;  %v2654_v44 = vpop.f32.mrf.mxu1 }
 0x211   : > { %v1825_v11 = vmax.f32 %v1763_v47, 0.0  ;;  %v1671_v12 = vadd.f32 %v2589_v25, %v3670_v6 }
 0x212   : > { %v2591_v15 = vpop.f32.mrf.mxu0  ;;  %v2655_v16 = vpop.f32.mrf.mxu1 }
 0x213   : > { %v1867_v53 = vpack.c.bf16 %v1825_v11, %v1822_v45  ;;  %v2592_v57 = vadd.f32 %v2591_v15, %v2590_v0  ;;  %v1768_v30 = vadd.f32 %v2653_v54, %v1671_v12  ;;  %v2656_v34 = vadd.f32 %v2655_v16, %v2654_v44 }
 0x214   : > { %v2593_v58 = vpop.f32.mrf.mxu0  ;;  %v2657_v29 = vpop.f32.mrf.mxu1 }
 0x215   : > { %v1674_v33 = vadd.f32 %v2592_v57, %v3670_v6  ;;  %2784 = vmatmul.mubr.bf16.vlgmr.msra.gmra.mxu1 %v1867_v53  ;;  %v1828_v8 = vmax.f32 %v1768_v30, 0.0 }
 0x216   : > { %v2594_v18 = vpop.f32.mrf.mxu0  ;;  %v2658_v19 = vpop.f32.mrf.mxu1 }
 0x217   : > { %v1771_v22 = vadd.f32 %v2656_v34, %v1674_v33  ;;  %v2595_v23 = vadd.f32 %v2594_v18, %v2593_v58  ;;  %v2659_v31 = vadd.f32 %v2658_v19, %v2657_v29 }
 0x218   : > { %v2596_v7 = vpop.f32.mrf.mxu0  ;;  %v2660_v60 = vpop.f32.mrf.mxu1 }
 0x219   : > { %v1831_v9 = vmax.f32 %v1771_v22, 0.0  ;;  %v1679_v55 = vadd.f32 %v2595_v23, %v3670_v6 }
 0x21a   : > { %v2597_v27 = vpop.f32.mrf.mxu0  ;;  %v2661_v28 = vpop.f32.mrf.mxu1 }
 0x21b   : > { %v2598_v59 = vadd.f32 %v2597_v27, %v2596_v7  ;;  %v1870_v32 = vpack.c.bf16 %v1831_v9, %v1828_v8  ;;  %v1776_v41 = vadd.f32 %v2659_v31, %v1679_v55  ;;  %v2662_v43 = vadd.f32 %v2661_v28, %v2660_v60 }
 0x21c   : > { %v2599_v35 = vpop.f32.mrf.mxu0  ;;  %v2663_v38 = vpop.f32.mrf.mxu1 }
 0x21d   : > { %v1682_v42 = vadd.f32 %v2598_v59, %v3670_v6  ;;  %2787 = vmatprep.mubr.bf16.mxu1 %v1870_v32  ;;  %v1834_v50 = vmax.f32 %v1776_v41, 0.0 }
 0x21e   : > { %v2600_v36 = vpop.f32.mrf.mxu0  ;;  %v2664_v40 = vpop.f32.mrf.mxu1 }
 0x21f   : > { %v1779_v56 = vadd.f32 %v2662_v43, %v1682_v42  ;;  %v2601_v48 = vadd.f32 %v2600_v36, %v2599_v35  ;;  %v2665_v62 = vadd.f32 %v2664_v40, %v2663_v38 }
 0x220   : > { %v2602_v37 = vpop.f32.mrf.mxu0  ;;  %v2666_v49 = vpop.f32.mrf.mxu1 }
 0x221   : > { %v1837_v51 = vmax.f32 %v1779_v56, 0.0  ;;  %v1687_v39 = vadd.f32 %v2601_v48, %v3670_v6 }
 0x222   : > { %v2603_v52 = vpop.f32.mrf.mxu0  ;;  %v2667_v61 = vpop.f32.mrf.mxu1 }
 0x223   : > { %v2604_v63 = vadd.f32 %v2603_v52, %v2602_v37  ;;  %v1873_v1 = vpack.c.bf16 %v1837_v51, %v1834_v50  ;;  %v1784_v4 = vadd.f32 %v2665_v62, %v1687_v39  ;;  %v2668_v10 = vadd.f32 %v2667_v61, %v2666_v49 }
 0x224   : > { %v2605_v2 = vpop.f32.mrf.mxu0  ;;  %v2669_v3 = vpop.f32.mrf.mxu1 }
 0x225   : > { %v1690_v5 = vadd.f32 %v2604_v63, %v3670_v6  ;;  %2788 = vmatmul.mubr.bf16.gmra.mxu1 %v1873_v1  ;;  %v1840_v46 = vmax.f32 %v1784_v4, 0.0 }
 0x226   : > { %v2606_v13 = vpop.f32.mrf.mxu0  ;;  %v2670_v14 = vpop.f32.mrf.mxu1 }
 0x227   : > { %v1787_v17 = vadd.f32 %v2668_v10, %v1690_v5  ;;  %v2607_v20 = vadd.f32 %v2606_v13, %v2605_v2  ;;  %v2671_v44 = vadd.f32 %v2670_v14, %v2669_v3 }
 0x228   : > { %v2608_v21 = vpop.f32.mrf.mxu0  ;;  %v2672_v26 = vpop.f32.mrf.mxu1 }
 0x229   : > { %v1843_v24 = vmax.f32 %v1787_v17, 0.0  ;;  %v1695_v47 = vadd.f32 %v2607_v20, %v3670_v6 }
 0x22a   : > { %v2609_v25 = vpop.f32.mrf.mxu0  ;;  %v2673_v0 = vpop.f32.mrf.mxu1 }
 0x22b   : > { %v2610_v45 = vadd.f32 %v2609_v25, %v2608_v21  ;;  %v1876_v11 = vpack.c.bf16 %v1843_v24, %v1840_v46  ;;  %v1792_v16 = vadd.f32 %v2671_v44, %v1695_v47  ;;  %v2674_v54 = vadd.f32 %v2673_v0, %v2672_v26 }
 0x22c   : > { %v2611_v12 = vpop.f32.mrf.mxu0  ;;  %v2675_v15 = vpop.f32.mrf.mxu1 }
 0x22d   : > { %v1698_v53 = vadd.f32 %v2610_v45, %v3670_v6  ;;  %2791 = vmatprep.mubr.bf16.mxu1 %v1876_v11  ;;  %v1846_v18 = vmax.f32 %v1792_v16, 0.0 }
 0x22e   : > { %v2612_v57 = vpop.f32.mrf.mxu0  ;;  %v2676_v58 = vpop.f32.mrf.mxu1 }
 0x22f   : > { %v1795_v29 = vadd.f32 %v2674_v54, %v1698_v53  ;;  %v2613_v30 = vadd.f32 %v2612_v57, %v2611_v12  ;;  %v2677_v60 = vadd.f32 %v2676_v58, %v2675_v15  ;;  %v3699_v53 = vld [vmem:[%s3799_s6] ss:$0 sm:$0xff] }
 0x230   : > { %v2614_v33 = vpop.f32.mrf.mxu0  ;;  %v2678_v34 = vpop.f32.mrf.mxu1 }
 0x231   : > { %v1849_v19 = vmax.f32 %v1795_v29, 0.0  ;;  %v1703_v22 = vadd.f32 %v2613_v30, %v3670_v6 }
 0x232   : > { %v2615_v23 = vpop.f32.mrf.mxu0  ;;  %v2679_v7 = vpop.f32.mrf.mxu1 }
 0x233   : > { %v2616_v8 = vadd.f32 %v2615_v23, %v2614_v33  ;;  %v1879_v9 = vpack.c.bf16 %v1849_v19, %v1846_v18  ;;  %v1800_v28 = vadd.f32 %v2677_v60, %v1703_v22  ;;  %v2680_v59 = vadd.f32 %v2679_v7, %v2678_v34 }
 0x234   : > { %v2617_v55 = vpop.f32.mrf.mxu0  ;;  %v2681_v27 = vpop.f32.mrf.mxu1 }
 0x235   : > { %v1706_v31 = vadd.f32 %v2616_v8, %v3670_v6  ;;  %2792 = vmatmul.mubr.bf16.gmra.mxu1 %v1879_v9  ;;  %v1852_v36 = vmax.f32 %v1800_v28, 0.0 }
 0x236   : > { %v2618_v32 = vpop.f32.mrf.mxu0  ;;  %v2682_v35 = vpop.f32.mrf.mxu1 }
 0x237   : > { %v1803_v38 = vadd.f32 %v2680_v59, %v1706_v31  ;;  %v2619_v41 = vadd.f32 %v2618_v32, %v2617_v55  ;;  %v2683_v49 = vadd.f32 %v2682_v35, %v2681_v27 }
 0x238   : > { %v2620_v42 = vpop.f32.mrf.mxu0  ;;  %v2684_v43 = vpop.f32.mrf.mxu1 }
 0x239   : > { %v1855_v40 = vmax.f32 %v1803_v38, 0.0  ;;  %v1711_v56 = vadd.f32 %v2619_v41, %v3670_v6 }
 0x23a   : > { %v2621_v48 = vpop.f32.mrf.mxu0  ;;  %v2685_v37 = vpop.f32.mrf.mxu1 }
 0x23b   : > { %v2622_v50 = vadd.f32 %v2621_v48, %v2620_v42  ;;  %v1882_v51 = vpack.c.bf16 %v1855_v40, %v1852_v36  ;;  %v1808_v39 = vadd.f32 %v2683_v49, %v1711_v56  ;;  %v2686_v61 = vadd.f32 %v2685_v37, %v2684_v43 }
 0x23d   : > { %v1714_v52 = vadd.f32 %v2622_v50, %v3670_v6  ;;  %2795 = vmatprep.mubr.bf16.mxu1 %v1882_v51  ;;  %v1858_v63 = vmax.f32 %v1808_v39, 0.0 }
 0x23f   : > { %v1811_v62 = vadd.f32 %v2686_v61, %v1714_v52 }
 0x241   : > { %v1861_v1 = vmax.f32 %v1811_v62, 0.0 }
 0x243   : > { %v1885_v2 = vpack.c.bf16 %v1861_v1, %v1858_v63 }
 0x245   : > { %2796 = vmatmul.mubr.bf16.gmra.mxu1 %v1885_v2 }
 0x28c   : > { %v2703_v3 = vpop.f32.mrf.mxu0 }
 0x28e   : > { %v2704_v4 = vpop.f32.mrf.mxu0 }
 0x28f   : > { %v2705_v16 = vadd.f32 %v2704_v4, %v2703_v3 }
 0x290   : > { %v2706_v5 = vpop.f32.mrf.mxu0 }
 0x291   : > { %v2120_v34 = vadd.f32 %v2705_v16, %v3699_v53 }
 0x292   : > { %v2707_v10 = vpop.f32.mrf.mxu0 }
 0x293   : > { %v2708_v30 = vadd.f32 %v2707_v10, %v2706_v5 }
 0x294   : > { %v2709_v13 = vpop.f32.mrf.mxu0 }
 0x295   : > { %v2123_v8 = vadd.f32 %v2708_v30, %v3699_v53 }
 0x296   : > { %v2710_v14 = vpop.f32.mrf.mxu0 }
 0x297   : > { %v2711_v12 = vadd.f32 %v2710_v14, %v2709_v13 }
 0x298   : > { %v2712_v17 = vpop.f32.mrf.mxu0 }
 0x299   : > { %v2128_v57 = vadd.f32 %v2711_v12, %v3699_v53 }
 0x29a   : > { %v2713_v20 = vpop.f32.mrf.mxu0 }
 0x29b   : > { %v2714_v54 = vadd.f32 %v2713_v20, %v2712_v17 }
 0x29c   : > { %v2715_v21 = vpop.f32.mrf.mxu0 }
 0x29d   : > { %v2131_v22 = vadd.f32 %v2714_v54, %v3699_v53 }
 0x29e   : > { %v2716_v26 = vpop.f32.mrf.mxu0 }
 0x29f   : > { %v2717_v59 = vadd.f32 %v2716_v26, %v2715_v21 }
 0x2a0   : > { %v2718_v46 = vpop.f32.mrf.mxu0 }
 0x2a1   : > { %v2136_v40 = vadd.f32 %v2717_v59, %v3699_v53 }
 0x2a2   : > { %v2719_v24 = vpop.f32.mrf.mxu0 }
 0x2a3   : > { %v2720_v43 = vadd.f32 %v2719_v24, %v2718_v46 }
 0x2a4   : > { %v2721_v6 = vpop.f32.mrf.mxu0 }
 0x2a5   : > { %v2139_v61 = vadd.f32 %v2720_v43, %v3699_v53 }
 0x2a6   : > { %v2722_v47 = vpop.f32.mrf.mxu0 }
 0x2a7   : > { %v2723_v28 = vadd.f32 %v2722_v47, %v2721_v6 }
 0x2a8   : > { %v2724_v25 = vpop.f32.mrf.mxu0 }
 0x2a9   : > { %v2144_v35 = vadd.f32 %v2723_v28, %v3699_v53 }
 0x2aa   : > { %v2725_v0 = vpop.f32.mrf.mxu0 }
 0x2ab   : > { %v2726_v32 = vadd.f32 %v2725_v0, %v2724_v25 }
 0x2ac   : > { %v3688_v44 = vpop.f32.mrf.mxu0 }
 0x2ad   : > { %v2147_v49 = vadd.f32 %v2726_v32, %v3699_v53 }
 0x2ae   : > { %v3690_v45 = vpop.f32.mrf.mxu0 }
 0x2af   : > { %v2729_v5 = vadd.f32 %v3690_v45, %v3688_v44 }
 0x2b0   : > { %v3692_v11 = vpop.f32.mrf.mxu0 }
 0x2b1   : > { %v2152_v46 = vadd.f32 %v2729_v5, %v3699_v53 }
 0x2b2   : > { %v3694_v15 = vpop.f32.mrf.mxu0 }
 0x2b3   : > { %v2732_v21 = vadd.f32 %v3694_v15, %v3692_v11 }
 0x2b4   : > { %v2733_v58 = vpop.f32.mrf.mxu0 }
 0x2b5   : > { %v2155_v11 = vadd.f32 %v2732_v21, %v3699_v53 }
 0x2b6   : > { %v2734_v23 = vpop.f32.mrf.mxu0 }
 0x2b7   : > { %v2735_v3 = vadd.f32 %v2734_v23, %v2733_v58 }
 0x2b8   : > { %v2736_v27 = vpop.f32.mrf.mxu0 }
 0x2b9   : > { %v2160_v13 = vadd.f32 %v2735_v3, %v3699_v53 }
 0x2ba   : > { %v2737_v31 = vpop.f32.mrf.mxu0 }
 0x2bb   : > { %v2738_v10 = vadd.f32 %v2737_v31, %v2736_v27 }
 0x2bc   : > { %v2739_v41 = vpop.f32.mrf.mxu0 }
 0x2bd   : > { %v2163_v25 = vadd.f32 %v2738_v10, %v3699_v53 }
 0x2be   : > { %v2740_v51 = vpop.f32.mrf.mxu0 }
 0x2bf   : > { %v2741_v30 = vadd.f32 %v2740_v51, %v2739_v41 }
 0x2c0   : > { %v2742_v2 = vpop.f32.mrf.mxu0 }
 0x2c2   : > { %v2743_v4 = vpop.f32.mrf.mxu0 }
 0x2c4   : > { %v2745_v17 = vpop.f32.mrf.mxu0 }
 0x2c6   : > { %v2746_v44 = vpop.f32.mrf.mxu0 }
 0x2c7   : > { %v2747_v58 = vadd.f32 %v2746_v44, %v2745_v17 }
 0x2d5   : > { %v2785_v29 = vpop.f32.mrf.mxu1 }
 0x2d6   : > { %v2225_v33 = vadd.f32 %v2785_v29, %v2128_v57  ;;  %v2748_v57 = vpop.f32.mrf.mxu0 }
 0x2d7   : > { %v2216_v18 = vpop.f32.mrf.mxu1 }
 0x2d8   : > { %3018 = vtanh.f32 %v2225_v33  ;;  %v2217_v19 = vadd.f32 %v2216_v18, %v2120_v34  ;;  %v2749_v29 = vpop.f32.mrf.mxu0  ;;  %v2176_v34 = vadd.f32 %v2747_v58, %v3699_v53 }
 0x2d9   : > { %v2786_v7 = vpop.f32.mrf.mxu1  ;;  %v2750_v33 = vadd.f32 %v2749_v29, %v2748_v57 }
 0x2da   : > { %3020 = vtanh.f32 %v2217_v19  ;;  %v2228_v60 = vadd.f32 %v2786_v7, %v2131_v22  ;;  %v2744_v22 = vadd.f32 %v2743_v4, %v2742_v2  ;;  %v2168_v7 = vadd.f32 %v2741_v30, %v3699_v53 }
 0x2db   : > { %v2219_v9 = vpop.f32.mrf.mxu1 }
 0x2dc   : > { %3022 = vtanh.f32 %v2228_v60  ;;  %v2220_v55 = vadd.f32 %v2219_v9, %v2123_v8  ;;  %v2171_v59 = vadd.f32 %v2744_v22, %v3699_v53 }
 0x2de   : > { %3024 = vtanh.f32 %v2220_v55  ;;  %v2179_v55 = vadd.f32 %v2750_v33, %v3699_v53 }
 0x2e5   : > { %v3019_v38 = vpop.eup %3018  ;;  %v2789_v42 = vpop.f32.mrf.mxu1 }
 0x2e6   : > { %2297 = vst [vmem:[%s3709_s14 + $0x10] sm:$0xff] %v3019_v38  ;;  %v2241_v36 = vadd.f32 %v2789_v42, %v2144_v35 }
 0x2e7   : > { %v3021_v56 = vpop.eup %3020  ;;  %v2232_v48 = vpop.f32.mrf.mxu1 }
 0x2e8   : > { %2295 = vst [vmem:[%s3709_s14] sm:$0xff] %v3021_v56  ;;  %3026 = vtanh.f32 %v2241_v36  ;;  %v2233_v37 = vadd.f32 %v2232_v48, %v2136_v40 }
 0x2e9   : > { %v3023_v50 = vpop.eup %3022  ;;  %v2790_v39 = vpop.f32.mrf.mxu1 }
 0x2ea   : > { %2298 = vst [vmem:[%s3709_s14 + $0x18] sm:$0xff] %v3023_v50  ;;  %3028 = vtanh.f32 %v2233_v37  ;;  %v2244_v52 = vadd.f32 %v2790_v39, %v2147_v49 }
 0x2eb   : > { %v3025_v62 = vpop.eup %3024  ;;  %v2235_v63 = vpop.f32.mrf.mxu1 }
 0x2ec   : > { %2296 = vst [vmem:[%s3709_s14 + $0x8] sm:$0xff] %v3025_v62  ;;  %3030 = vtanh.f32 %v2244_v52  ;;  %v2236_v1 = vadd.f32 %v2235_v63, %v2139_v61 }
 0x2ee   : > { %3032 = vtanh.f32 %v2236_v1 }
 0x2f5   : > { %v3027_v14 = vpop.eup %3026  ;;  %v2793_v20 = vpop.f32.mrf.mxu1 }
 0x2f6   : > { %2301 = vst [vmem:[%s3709_s14 + $0x30] sm:$0xff] %v3027_v14  ;;  %v2257_v26 = vadd.f32 %v2793_v20, %v2160_v13 }
 0x2f7   : > { %v3029_v24 = vpop.eup %3028  ;;  %v2248_v6 = vpop.f32.mrf.mxu1 }
 0x2f8   : > { %2299 = vst [vmem:[%s3709_s14 + $0x20] sm:$0xff] %v3029_v24  ;;  %3034 = vtanh.f32 %v2257_v26  ;;  %v2249_v47 = vadd.f32 %v2248_v6, %v2152_v46 }
 0x2f9   : > { %v3031_v0 = vpop.eup %3030  ;;  %v2794_v45 = vpop.f32.mrf.mxu1 }
 0x2fa   : > { %2302 = vst [vmem:[%s3709_s14 + $0x38] sm:$0xff] %v3031_v0  ;;  %3036 = vtanh.f32 %v2249_v47  ;;  %v2260_v12 = vadd.f32 %v2794_v45, %v2163_v25 }
 0x2fb   : > { %v3033_v15 = vpop.eup %3032  ;;  %v2251_v16 = vpop.f32.mrf.mxu1 }
 0x2fc   : > { %2300 = vst [vmem:[%s3709_s14 + $0x28] sm:$0xff] %v3033_v15  ;;  %3038 = vtanh.f32 %v2260_v12  ;;  %v2252_v54 = vadd.f32 %v2251_v16, %v2155_v11 }
 0x2fe   : > { %3040 = vtanh.f32 %v2252_v54 }
 0x305   : > { %v3035_v18 = vpop.eup %3034  ;;  %v2797_v19 = vpop.f32.mrf.mxu1 }
 0x306   : > { %2305 = vst [vmem:[%s3709_s14 + $0x50] sm:$0xff] %v3035_v18  ;;  %v2273_v23 = vadd.f32 %v2797_v19, %v2176_v34 }
 0x307   : > { %v3037_v60 = vpop.eup %3036  ;;  %v2264_v8 = vpop.f32.mrf.mxu1 }
 0x308   : > { %2303 = vst [vmem:[%s3709_s14 + $0x40] sm:$0xff] %v3037_v60  ;;  %3042 = vtanh.f32 %v2273_v23  ;;  %v2265_v9 = vadd.f32 %v2264_v8, %v2168_v7 }
 0x309   : > { %v3039_v27 = vpop.eup %3038  ;;  %v2798_v28 = vpop.f32.mrf.mxu1 }
 0x30a   : > { %2306 = vst [vmem:[%s3709_s14 + $0x58] sm:$0xff] %v3039_v27  ;;  %3044 = vtanh.f32 %v2265_v9  ;;  %v2276_v31 = vadd.f32 %v2798_v28, %v2179_v55 }
 0x30b   : > { %v3041_v32 = vpop.eup %3040  ;;  %v2267_v35 = vpop.f32.mrf.mxu1 }
 0x30c   : > { %2304 = vst [vmem:[%s3709_s14 + $0x48] sm:$0xff] %v3041_v32  ;;  %3046 = vtanh.f32 %v2276_v31  ;;  %v2268_v38 = vadd.f32 %v2267_v35, %v2171_v59 }
 0x30e   : > { %3048 = vtanh.f32 %v2268_v38 }
 0x315   : > { %v3043_v41 = vpop.eup %3042 }
 0x316   : > { %2309 = vst [vmem:[%s3709_s14 + $0x70] sm:$0xff] %v3043_v41 }
 0x317   : > { %v3045_v42 = vpop.eup %3044 }
 0x318   : > { %2307 = vst [vmem:[%s3709_s14 + $0x60] sm:$0xff] %v3045_v42 }
 0x319   : > { %v3047_v43 = vpop.eup %3046 }
 0x31a   : > { %2310 = vst [vmem:[%s3709_s14 + $0x78] sm:$0xff] %v3047_v43 }
 0x31b   : > { %v3049_v53 = vpop.eup %3048 }
 0x31c   : > { %2308 = vst [vmem:[%s3709_s14 + $0x68] sm:$0xff] %v3049_v53 }
 0x31d   : > { %3089 = shalt.err (!%p3086_p0)
}
 0x31e   : > { %s3090_s8 = scalar_lea.hbm %s3745_s19, 2048  ;;  %s3094_s13 = scalar_lea.hbm %s3800_s7, 4096 }
 0x31f   : > { %p3091_p1 = scmp.ne.s32.totalorder %s3745_s19, %s3090_s8  ;;  %p3095_p4 = scmp.lt.s32.totalorder %s3745_s19, %s3800_s7 }
 0x320   : > { %p3096_p7 = scmp.lt.s32.totalorder %s3094_s13, %s3090_s8 }
 0x321   : > { %p3092_p2 = pnand %p3091_p1, %p3227_p5 }
 0x322   : > { %p3097_p6 = por %p3096_p7, %p3095_p4 }
 0x323   : > { %p3093_p3 = pneg %p3092_p2 }
 0x325   : > { %p3098_p8 = pnand %p3097_p6, %p3093_p3 }
 0x327   : > { %3101 = shalt.err (!%p3098_p8)
}
 0x328   : > { %s3147_s17 = smov 128   ;;  %s3148_s18 = smov 8  }
 0x329   : > { %2803 = dma.vmem_to_hbm [thread:$0]  (%p3227_p5), %s3747_s16, 2048, %s3745_s19, %s3753_s20, %s3147_s17, %s3147_s17, %s3148_s18  }
 0x32a PF: > { %p2815_p9 = scmp.ge.s32.totalorder %s3140_s27, 2  ;;  %s2340_s28 = sand.u32 1, %s3128_s24  }
 0x32b   : > { %p3804_p10 = scmp.ne.s32.totalorder %s3802_s12, 0  ;;  %s2341_s21 = scalar_lea.sflag [#allocation4], %s2340_s28 }
 0x32d   : > { %p2810_p11 = pnand %p2815_p9, %p3804_p10 }
 0x32f   : > { %p2811_p12 = pneg %p2810_p11 }
 0x331   : > { %3123 = dma.done.wait (%p2811_p12), %s2341_s21, 2048  }
 0x332   : > { %3125 = vsyncadd (%p2811_p12), %s2341_s21, 4294965248  ;;  %p18_p13 = scmp.ge.s32.totalorder %s3214_s30, 4   ;;  %s3805_s24 = smov %s3132_s25 }
 0x333   : > { %s3806_s25 = smov %s3136_s26  ;;  %s3807_s26 = smov %s3225_s10 }
 0x334   : > { %s3808_s27 = smov %s3214_s30  ;;  %20 = sbr.rel (!%p18_p13) target bundleno = 4 (0x4), region = 88 }
 0x339   :  { %2346 = vsyncpa [#allocation3], 1 }
 0x33a   :  { %2348 = vsyncpa [#allocation3 + $0x1], 1 }
 0x33b   :  { %2349 = vsyncpa [#allocation4], 1 }
 0x33c   :  { %2351 = vsyncpa [#allocation4 + $0x1], 1 }

</bundles_post_ra>
